<compile_context>
chip_gen: v7x
topology: tpu7x:2x2x1
jax: 0.10.0
libtpu: 0.0.40
codegen_flags: <defaults>
</compile_context>

<pallas_src>
import math

import jax
import jax.numpy as jnp
from jax.experimental import pallas as pl
from jax.experimental.pallas import tpu as pltpu

# ---- model hyper-parameters (fixed by the PyTorch module) -------------------
B = 2               # batch
T = 20              # sequence length of the 1-D input signal
IN = 1              # input_size
H = 64              # hidden_size
G = 4 * H           # stacked gate width, PyTorch gate order: i, f, g, o
NUM_CLASSES = 5

# packed parameter slab row layout (width = G = 256 lanes)
WHH_ROW0 = 0          # rows [0, H)      : weight_hh^T, gate columns pre-scaled
FCW_ROW0 = H          # rows [H, 2H)     : fc.weight^T zero-padded to G lanes
WIH_ROW = 2 * H       # row 2H           : weight_ih[:, 0] row, pre-scaled
BIAS_ROW = 2 * H + 1  # row 2H + 1       : (bias_ih + bias_hh) row, pre-scaled
FCB_ROW = 2 * H + 2   # row 2H + 2       : fc.bias zero-padded to G lanes
SLAB_ROWS = 2 * H + 3


# ---- the Pallas kernel -------------------------------------------------------
def lstm_kernel(x_ref, slab_ref, out_ref, xp_ref):
    # x_ref    : (T, B, 1)        time-major scalar inputs
    # slab_ref : (SLAB_ROWS, G)   packed parameters (gate pre-scale folded in)
    # out_ref  : (B, 5)
    # xp_ref   : (T, B, G)        VMEM scratch: hoisted per-step input term

    wih = slab_ref[WIH_ROW:WIH_ROW + 1, :]            # (1, G)
    bias = slab_ref[BIAS_ROW:BIAS_ROW + 1, :]         # (1, G)

    # Input projection for ALL timesteps / batches / gates at once (lane-dense,
    # 256-wide), hoisted out of the serial recurrence; bias and the sigmoid
    # pre-scale are already folded in.  Stored to VMEM so the loop does aligned
    # leading-axis reads instead of holding ~10 vregs live for 20 steps.
    xp_ref[...] = x_ref[...] * wih + bias             # (T, B, G)

    whh = slab_ref[WHH_ROW0:WHH_ROW0 + H, :]          # (H, G), pre-scaled

    # Per-lane affine applied after the single fused tanh:
    #   i/f/o lanes: sigmoid(u) = 0.5 * tanh(u/2) + 0.5   (u/2 folded in weights)
    #   g lanes    : tanh(u)                               (identity affine)
    lane = jax.lax.broadcasted_iota(jnp.int32, (B, G), 1)
    is_g = (lane >= 2 * H) & (lane < 3 * H)
    post_a = jnp.where(is_g, 1.0, 0.5).astype(jnp.float32)
    post_b = jnp.where(is_g, 0.0, 0.5).astype(jnp.float32)

    h = jnp.zeros((B, H), jnp.float32)
    c = jnp.zeros((B, H), jnp.float32)

    # Short fixed trip-count recurrence, statically unrolled so every index is
    # static and the LLO scheduler sees the whole dependency chain.
    for t in range(T):
        zx = xp_ref[t]                                 # (B, G), aligned vld
        if t == 0:
            z = zx                                     # h_0 == 0: skip matmul
        else:
            # one lane-dense recurrent matmul covering all 4 gates
            z = zx + jnp.dot(h, whh, preferred_element_type=jnp.float32)

        # ONE EUP tanh over the whole (B, 4H) pre-activation, then per-lane affine.
        act = jnp.tanh(z) * post_a + post_b            # (B, G)

        # [i | f | g | o]: i/g share the low halves, f/o the high halves of the
        # two packed vregs, so the products below are lane-aligned.
        i = act[:, 0 * H:1 * H]
        f = act[:, 1 * H:2 * H]
        g = act[:, 2 * H:3 * H]
        o = act[:, 3 * H:4 * H]
        c = f * c + i * g
        h = o * jnp.tanh(c)

    # classifier head on the final hidden state (out[:, -1, :] in the module);
    # fc weight is zero-padded to G lanes so the matmul stays lane-dense.
    fcw = slab_ref[FCW_ROW0:FCW_ROW0 + H, :]           # (H, G)
    fcb = slab_ref[FCB_ROW:FCB_ROW + 1, :]             # (1, G)
    logits = jnp.dot(h, fcw, preferred_element_type=jnp.float32)  # (B, G)
    out_ref[...] = (logits + fcb)[:, :NUM_CLASSES]


# ---- parameter packing (runs ONCE, outside the per-call path) -----------------
def pack_params(params):
    w_ih = params["w_ih"]                  # (4H, 1)
    w_hh = params["w_hh"]                  # (4H, H)
    bias = params["b_ih"] + params["b_hh"] # (4H,)
    fc_w = params["fc_w"]                  # (5, H)
    fc_b = params["fc_b"]                  # (5,)

    # sigmoid pre-scale: 0.5 on i/f/o gate lanes, 1.0 on g lanes
    lane = jnp.arange(G)
    pre = jnp.where((lane >= 2 * H) & (lane < 3 * H), 1.0, 0.5).astype(jnp.float32)

    whh_t = (w_hh.T * pre[None, :]).astype(jnp.float32)          # (H, G)
    wih_row = (w_ih[:, 0] * pre)[None, :].astype(jnp.float32)    # (1, G)
    bias_row = (bias * pre)[None, :].astype(jnp.float32)         # (1, G)

    fcw_pad = jnp.zeros((H, G), jnp.float32).at[:, :NUM_CLASSES].set(fc_w.T)
    fcb_pad = jnp.zeros((1, G), jnp.float32).at[0, :NUM_CLASSES].set(fc_b)

    slab = jnp.concatenate([whh_t, fcw_pad, wih_row, bias_row, fcb_pad], axis=0)
    assert slab.shape == (SLAB_ROWS, G)
    return slab


# ---- per-call wrapper ----------------------------------------------------------
@jax.jit
def lstm_forward(x, slab):
    """x: (B, T) float32, slab: packed params -> logits (B, 5)."""
    x_tb1 = x.T.reshape(T, B, 1)           # layout glue only (time-major)
    return pl.pallas_call(
        lstm_kernel,
        out_shape=jax.ShapeDtypeStruct((B, NUM_CLASSES), jnp.float32),
        in_specs=[pl.BlockSpec(memory_space=pltpu.MemorySpace.VMEM)] * 2,
        out_specs=pl.BlockSpec(memory_space=pltpu.MemorySpace.VMEM),
        scratch_shapes=[pltpu.VMEM((T, B, G), jnp.float32)],
        compiler_params=pltpu.CompilerParams(vmem_limit_bytes=8 * 1024 * 1024),
    )(x_tb1, slab)


# ---- pure-JAX reference (PyTorch nn.LSTM semantics) ---------------------------
def lstm_ref(x, params):
    w_ih, w_hh = params["w_ih"], params["w_hh"]
    b_ih, b_hh = params["b_ih"], params["b_hh"]
    fc_w, fc_b = params["fc_w"], params["fc_b"]
    h = jnp.zeros((x.shape[0], H), jnp.float32)
    c = jnp.zeros((x.shape[0], H), jnp.float32)
    for t in range(T):
        x_t = x[:, t:t + 1]                                     # (B, 1)
        z = x_t @ w_ih.T + b_ih + h @ w_hh.T + b_hh             # (B, 4H)
        i = jax.nn.sigmoid(z[:, 0 * H:1 * H])
        f = jax.nn.sigmoid(z[:, 1 * H:2 * H])
        g = jnp.tanh(z[:, 2 * H:3 * H])
        o = jax.nn.sigmoid(z[:, 3 * H:4 * H])
        c = f * c + i * g
        h = o * jnp.tanh(c)
    return h @ fc_w.T + fc_b


# ---- deterministic parameter construction -------------------------------------
def init_params(key):
    ks = jax.random.split(key, 6)
    bound = 1.0 / math.sqrt(H)

    def u(k, shape):
        return jax.random.uniform(k, shape, jnp.float32, -bound, bound)

    return {
        "w_ih": u(ks[0], (G, IN)),
        "w_hh": u(ks[1], (G, H)),
        "b_ih": u(ks[2], (G,)),
        "b_hh": u(ks[3], (G,)),
        "fc_w": u(ks[4], (NUM_CLASSES, H)),
        "fc_b": u(ks[5], (NUM_CLASSES,)),
    }


if __name__ == "__main__":
    key = jax.random.PRNGKey(0)
    kx, kp = jax.random.split(key)
    x = jax.random.normal(kx, (B, T), dtype=jnp.float32)
    params = init_params(kp)

    slab = pack_params(params)              # once, outside the per-call path
    out = lstm_forward(x, slab)
    jax.block_until_ready(out)

    assert out.shape == (B, NUM_CLASSES)
    assert bool(jnp.all(jnp.isfinite(out)))

    ref = lstm_ref(x, params)
    max_err = float(jnp.max(jnp.abs(out - ref)))
    assert max_err < 1e-4, f"kernel/ref mismatch, max abs err = {max_err}"

    print("KERNEL_OK")
</pallas_src>

<mosaic_0001>
module attributes {stable_mosaic.version = 11 : i64} {
  func.func @lstm_kernel(%arg0: memref<20x2x1xf32, #tpu.memory_space<vmem>>, %arg1: memref<131x256xf32, #tpu.memory_space<vmem>>, %arg2: memref<2x5xf32, #tpu.memory_space<vmem>>, %arg3: memref<20x2x256xf32, #tpu.memory_space<vmem>>) attributes {dimension_semantics = [], scalar_prefetch = 0 : i64, scratch_operands = 1 : i64, tpu.core_type = #tpu.core_type<tc>} {
    %c128 = arith.constant 128 : index
    %c0 = arith.constant 0 : index
    %0 = vector.load %arg1[%c128, %c0] : memref<131x256xf32, #tpu.memory_space<vmem>>, vector<1x256xf32>
    %c129 = arith.constant 129 : index
    %c0_0 = arith.constant 0 : index
    %1 = vector.load %arg1[%c129, %c0_0] : memref<131x256xf32, #tpu.memory_space<vmem>>, vector<1x256xf32>
    %c0_1 = arith.constant 0 : index
    %c0_2 = arith.constant 0 : index
    %c0_3 = arith.constant 0 : index
    %2 = vector.load %arg0[%c0_1, %c0_2, %c0_3] : memref<20x2x1xf32, #tpu.memory_space<vmem>>, vector<20x2x1xf32>
    %3 = vector.shape_cast %0 : vector<1x256xf32> to vector<1x1x256xf32>
    %4 = vector.broadcast %2 : vector<20x2x1xf32> to vector<20x2x256xf32>
    %5 = vector.broadcast %3 : vector<1x1x256xf32> to vector<20x2x256xf32>
    %6 = arith.mulf %4, %5 : vector<20x2x256xf32>
    %7 = vector.shape_cast %1 : vector<1x256xf32> to vector<1x1x256xf32>
    %8 = vector.broadcast %7 : vector<1x1x256xf32> to vector<20x2x256xf32>
    %9 = arith.addf %6, %8 : vector<20x2x256xf32>
    %c0_4 = arith.constant 0 : index
    %c0_5 = arith.constant 0 : index
    %c0_6 = arith.constant 0 : index
    %10 = vector.load %arg3[%c0_4, %c0_5, %c0_6] : memref<20x2x256xf32, #tpu.memory_space<vmem>>, vector<20x2x256xf32>
    tpu.vector_store %arg3[%c0_4, %c0_5, %c0_6], %9 {strides = array<i32>} : memref<20x2x256xf32, #tpu.memory_space<vmem>>, vector<20x2x256xf32>,
    %c0_7 = arith.constant 0 : index
    %c0_8 = arith.constant 0 : index
    %11 = vector.load %arg1[%c0_7, %c0_8] : memref<131x256xf32, #tpu.memory_space<vmem>>, vector<64x256xf32>
    %12 = tpu.iota {dimensions = array<i32: 1>} : vector<2x256xi32>
    %c128_i32 = arith.constant 128 : i32
    %13 = vector.broadcast %c128_i32 : i32 to vector<2x256xi32>
    %14 = arith.cmpi sge, %12, %13 : vector<2x256xi32>
    %c192_i32 = arith.constant 192 : i32
    %15 = vector.broadcast %c192_i32 : i32 to vector<2x256xi32>
    %16 = arith.cmpi slt, %12, %15 : vector<2x256xi32>
    %17 = arith.andi %14, %16 : vector<2x256xi1>
    %cst = arith.constant 1.000000e+00 : f32
    %cst_9 = arith.constant 5.000000e-01 : f32
    %18 = vector.broadcast %cst : f32 to vector<2x256xf32>
    %19 = vector.broadcast %cst_9 : f32 to vector<2x256xf32>
    %20 = arith.select %17, %18, %19 : vector<2x256xi1>, vector<2x256xf32>
    %cst_10 = arith.constant 0.000000e+00 : f32
    %cst_11 = arith.constant 5.000000e-01 : f32
    %21 = vector.broadcast %cst_10 : f32 to vector<2x256xf32>
    %22 = vector.broadcast %cst_11 : f32 to vector<2x256xf32>
    %23 = arith.select %17, %21, %22 : vector<2x256xi1>, vector<2x256xf32>
    %cst_12 = arith.constant 0.000000e+00 : f32
    %24 = vector.broadcast %cst_12 : f32 to vector<2x64xf32>
    %c0_13 = arith.constant 0 : index
    %c0_14 = arith.constant 0 : index
    %c0_15 = arith.constant 0 : index
    %25 = vector.load %arg3[%c0_13, %c0_14, %c0_15] : memref<20x2x256xf32, #tpu.memory_space<vmem>>, vector<1x2x256xf32>
    %26 = vector.shape_cast %25 : vector<1x2x256xf32> to vector<2x256xf32>
    %27 = math.tanh %26 : vector<2x256xf32>
    %28 = arith.mulf %27, %20 : vector<2x256xf32>
    %29 = arith.addf %28, %23 : vector<2x256xf32>
    %30 = vector.extract_strided_slice %29 {offsets = [0, 0], sizes = [2, 64], strides = [1, 1]} : vector<2x256xf32> to vector<2x64xf32>
    %31 = vector.extract_strided_slice %29 {offsets = [0, 64], sizes = [2, 64], strides = [1, 1]} : vector<2x256xf32> to vector<2x64xf32>
    %32 = vector.extract_strided_slice %29 {offsets = [0, 128], sizes = [2, 64], strides = [1, 1]} : vector<2x256xf32> to vector<2x64xf32>
    %33 = vector.extract_strided_slice %29 {offsets = [0, 192], sizes = [2, 64], strides = [1, 1]} : vector<2x256xf32> to vector<2x64xf32>
    %34 = arith.mulf %31, %24 : vector<2x64xf32>
    %35 = arith.mulf %30, %32 : vector<2x64xf32>
    %36 = arith.addf %34, %35 : vector<2x64xf32>
    %37 = math.tanh %36 : vector<2x64xf32>
    %38 = arith.mulf %33, %37 : vector<2x64xf32>
    %c1 = arith.constant 1 : index
    %c0_16 = arith.constant 0 : index
    %c0_17 = arith.constant 0 : index
    %39 = vector.load %arg3[%c1, %c0_16, %c0_17] : memref<20x2x256xf32, #tpu.memory_space<vmem>>, vector<1x2x256xf32>
    %40 = vector.shape_cast %39 : vector<1x2x256xf32> to vector<2x256xf32>
    %cst_18 = arith.constant dense<0.000000e+00> : vector<2x256xf32>
    %41 = tpu.matmul %38, %11, %cst_18 {dimension_numbers = #tpu.dot_dimension_numbers<[1], [0], [0], [1], [0, 0, 1, 1], [], []>} : vector<2x64xf32>, vector<64x256xf32>, vector<2x256xf32> -> vector<2x256xf32>
    %42 = arith.addf %40, %41 : vector<2x256xf32>
    %43 = math.tanh %42 : vector<2x256xf32>
    %44 = arith.mulf %43, %20 : vector<2x256xf32>
    %45 = arith.addf %44, %23 : vector<2x256xf32>
    %46 = vector.extract_strided_slice %45 {offsets = [0, 0], sizes = [2, 64], strides = [1, 1]} : vector<2x256xf32> to vector<2x64xf32>
    %47 = vector.extract_strided_slice %45 {offsets = [0, 64], sizes = [2, 64], strides = [1, 1]} : vector<2x256xf32> to vector<2x64xf32>
    %48 = vector.extract_strided_slice %45 {offsets = [0, 128], sizes = [2, 64], strides = [1, 1]} : vector<2x256xf32> to vector<2x64xf32>
    %49 = vector.extract_strided_slice %45 {offsets = [0, 192], sizes = [2, 64], strides = [1, 1]} : vector<2x256xf32> to vector<2x64xf32>
    %50 = arith.mulf %47, %36 : vector<2x64xf32>
    %51 = arith.mulf %46, %48 : vector<2x64xf32>
    %52 = arith.addf %50, %51 : vector<2x64xf32>
    %53 = math.tanh %52 : vector<2x64xf32>
    %54 = arith.mulf %49, %53 : vector<2x64xf32>
    %c2 = arith.constant 2 : index
    %c0_19 = arith.constant 0 : index
    %c0_20 = arith.constant 0 : index
    %55 = vector.load %arg3[%c2, %c0_19, %c0_20] : memref<20x2x256xf32, #tpu.memory_space<vmem>>, vector<1x2x256xf32>
    %56 = vector.shape_cast %55 : vector<1x2x256xf32> to vector<2x256xf32>
    %cst_21 = arith.constant dense<0.000000e+00> : vector<2x256xf32>
    %57 = tpu.matmul %54, %11, %cst_21 {dimension_numbers = #tpu.dot_dimension_numbers<[1], [0], [0], [1], [0, 0, 1, 1], [], []>} : vector<2x64xf32>, vector<64x256xf32>, vector<2x256xf32> -> vector<2x256xf32>
    %58 = arith.addf %56, %57 : vector<2x256xf32>
    %59 = math.tanh %58 : vector<2x256xf32>
    %60 = arith.mulf %59, %20 : vector<2x256xf32>
    %61 = arith.addf %60, %23 : vector<2x256xf32>
    %62 = vector.extract_strided_slice %61 {offsets = [0, 0], sizes = [2, 64], strides = [1, 1]} : vector<2x256xf32> to vector<2x64xf32>
    %63 = vector.extract_strided_slice %61 {offsets = [0, 64], sizes = [2, 64], strides = [1, 1]} : vector<2x256xf32> to vector<2x64xf32>
    %64 = vector.extract_strided_slice %61 {offsets = [0, 128], sizes = [2, 64], strides = [1, 1]} : vector<2x256xf32> to vector<2x64xf32>
    %65 = vector.extract_strided_slice %61 {offsets = [0, 192], sizes = [2, 64], strides = [1, 1]} : vector<2x256xf32> to vector<2x64xf32>
    %66 = arith.mulf %63, %52 : vector<2x64xf32>
    %67 = arith.mulf %62, %64 : vector<2x64xf32>
    %68 = arith.addf %66, %67 : vector<2x64xf32>
    %69 = math.tanh %68 : vector<2x64xf32>
    %70 = arith.mulf %65, %69 : vector<2x64xf32>
    %c3 = arith.constant 3 : index
    %c0_22 = arith.constant 0 : index
    %c0_23 = arith.constant 0 : index
    %71 = vector.load %arg3[%c3, %c0_22, %c0_23] : memref<20x2x256xf32, #tpu.memory_space<vmem>>, vector<1x2x256xf32>
    %72 = vector.shape_cast %71 : vector<1x2x256xf32> to vector<2x256xf32>
    %cst_24 = arith.constant dense<0.000000e+00> : vector<2x256xf32>
    %73 = tpu.matmul %70, %11, %cst_24 {dimension_numbers = #tpu.dot_dimension_numbers<[1], [0], [0], [1], [0, 0, 1, 1], [], []>} : vector<2x64xf32>, vector<64x256xf32>, vector<2x256xf32> -> vector<2x256xf32>
    %74 = arith.addf %72, %73 : vector<2x256xf32>
    %75 = math.tanh %74 : vector<2x256xf32>
    %76 = arith.mulf %75, %20 : vector<2x256xf32>
    %77 = arith.addf %76, %23 : vector<2x256xf32>
    %78 = vector.extract_strided_slice %77 {offsets = [0, 0], sizes = [2, 64], strides = [1, 1]} : vector<2x256xf32> to vector<2x64xf32>
    %79 = vector.extract_strided_slice %77 {offsets = [0, 64], sizes = [2, 64], strides = [1, 1]} : vector<2x256xf32> to vector<2x64xf32>
    %80 = vector.extract_strided_slice %77 {offsets = [0, 128], sizes = [2, 64], strides = [1, 1]} : vector<2x256xf32> to vector<2x64xf32>
    %81 = vector.extract_strided_slice %77 {offsets = [0, 192], sizes = [2, 64], strides = [1, 1]} : vector<2x256xf32> to vector<2x64xf32>
    %82 = arith.mulf %79, %68 : vector<2x64xf32>
    %83 = arith.mulf %78, %80 : vector<2x64xf32>
    %84 = arith.addf %82, %83 : vector<2x64xf32>
    %85 = math.tanh %84 : vector<2x64xf32>
    %86 = arith.mulf %81, %85 : vector<2x64xf32>
    %c4 = arith.constant 4 : index
    %c0_25 = arith.constant 0 : index
    %c0_26 = arith.constant 0 : index
    %87 = vector.load %arg3[%c4, %c0_25, %c0_26] : memref<20x2x256xf32, #tpu.memory_space<vmem>>, vector<1x2x256xf32>
    %88 = vector.shape_cast %87 : vector<1x2x256xf32> to vector<2x256xf32>
    %cst_27 = arith.constant dense<0.000000e+00> : vector<2x256xf32>
    %89 = tpu.matmul %86, %11, %cst_27 {dimension_numbers = #tpu.dot_dimension_numbers<[1], [0], [0], [1], [0, 0, 1, 1], [], []>} : vector<2x64xf32>, vector<64x256xf32>, vector<2x256xf32> -> vector<2x256xf32>
    %90 = arith.addf %88, %89 : vector<2x256xf32>
    %91 = math.tanh %90 : vector<2x256xf32>
    %92 = arith.mulf %91, %20 : vector<2x256xf32>
    %93 = arith.addf %92, %23 : vector<2x256xf32>
    %94 = vector.extract_strided_slice %93 {offsets = [0, 0], sizes = [2, 64], strides = [1, 1]} : vector<2x256xf32> to vector<2x64xf32>
    %95 = vector.extract_strided_slice %93 {offsets = [0, 64], sizes = [2, 64], strides = [1, 1]} : vector<2x256xf32> to vector<2x64xf32>
    %96 = vector.extract_strided_slice %93 {offsets = [0, 128], sizes = [2, 64], strides = [1, 1]} : vector<2x256xf32> to vector<2x64xf32>
    %97 = vector.extract_strided_slice %93 {offsets = [0, 192], sizes = [2, 64], strides = [1, 1]} : vector<2x256xf32> to vector<2x64xf32>
    %98 = arith.mulf %95, %84 : vector<2x64xf32>
    %99 = arith.mulf %94, %96 : vector<2x64xf32>
    %100 = arith.addf %98, %99 : vector<2x64xf32>
    %101 = math.tanh %100 : vector<2x64xf32>
    %102 = arith.mulf %97, %101 : vector<2x64xf32>
    %c5 = arith.constant 5 : index
    %c0_28 = arith.constant 0 : index
    %c0_29 = arith.constant 0 : index
    %103 = vector.load %arg3[%c5, %c0_28, %c0_29] : memref<20x2x256xf32, #tpu.memory_space<vmem>>, vector<1x2x256xf32>
    %104 = vector.shape_cast %103 : vector<1x2x256xf32> to vector<2x256xf32>
    %cst_30 = arith.constant dense<0.000000e+00> : vector<2x256xf32>
    %105 = tpu.matmul %102, %11, %cst_30 {dimension_numbers = #tpu.dot_dimension_numbers<[1], [0], [0], [1], [0, 0, 1, 1], [], []>} : vector<2x64xf32>, vector<64x256xf32>, vector<2x256xf32> -> vector<2x256xf32>
    %106 = arith.addf %104, %105 : vector<2x256xf32>
    %107 = math.tanh %106 : vector<2x256xf32>
    %108 = arith.mulf %107, %20 : vector<2x256xf32>
    %109 = arith.addf %108, %23 : vector<2x256xf32>
    %110 = vector.extract_strided_slice %109 {offsets = [0, 0], sizes = [2, 64], strides = [1, 1]} : vector<2x256xf32> to vector<2x64xf32>
    %111 = vector.extract_strided_slice %109 {offsets = [0, 64], sizes = [2, 64], strides = [1, 1]} : vector<2x256xf32> to vector<2x64xf32>
    %112 = vector.extract_strided_slice %109 {offsets = [0, 128], sizes = [2, 64], strides = [1, 1]} : vector<2x256xf32> to vector<2x64xf32>
    %113 = vector.extract_strided_slice %109 {offsets = [0, 192], sizes = [2, 64], strides = [1, 1]} : vector<2x256xf32> to vector<2x64xf32>
    %114 = arith.mulf %111, %100 : vector<2x64xf32>
    %115 = arith.mulf %110, %112 : vector<2x64xf32>
    %116 = arith.addf %114, %115 : vector<2x64xf32>
    %117 = math.tanh %116 : vector<2x64xf32>
    %118 = arith.mulf %113, %117 : vector<2x64xf32>
    %c6 = arith.constant 6 : index
    %c0_31 = arith.constant 0 : index
    %c0_32 = arith.constant 0 : index
    %119 = vector.load %arg3[%c6, %c0_31, %c0_32] : memref<20x2x256xf32, #tpu.memory_space<vmem>>, vector<1x2x256xf32>
    %120 = vector.shape_cast %119 : vector<1x2x256xf32> to vector<2x256xf32>
    %cst_33 = arith.constant dense<0.000000e+00> : vector<2x256xf32>
    %121 = tpu.matmul %118, %11, %cst_33 {dimension_numbers = #tpu.dot_dimension_numbers<[1], [0], [0], [1], [0, 0, 1, 1], [], []>} : vector<2x64xf32>, vector<64x256xf32>, vector<2x256xf32> -> vector<2x256xf32>
    %122 = arith.addf %120, %121 : vector<2x256xf32>
    %123 = math.tanh %122 : vector<2x256xf32>
    %124 = arith.mulf %123, %20 : vector<2x256xf32>
    %125 = arith.addf %124, %23 : vector<2x256xf32>
    %126 = vector.extract_strided_slice %125 {offsets = [0, 0], sizes = [2, 64], strides = [1, 1]} : vector<2x256xf32> to vector<2x64xf32>
    %127 = vector.extract_strided_slice %125 {offsets = [0, 64], sizes = [2, 64], strides = [1, 1]} : vector<2x256xf32> to vector<2x64xf32>
    %128 = vector.extract_strided_slice %125 {offsets = [0, 128], sizes = [2, 64], strides = [1, 1]} : vector<2x256xf32> to vector<2x64xf32>
    %129 = vector.extract_strided_slice %125 {offsets = [0, 192], sizes = [2, 64], strides = [1, 1]} : vector<2x256xf32> to vector<2x64xf32>
    %130 = arith.mulf %127, %116 : vector<2x64xf32>
    %131 = arith.mulf %126, %128 : vector<2x64xf32>
    %132 = arith.addf %130, %131 : vector<2x64xf32>
    %133 = math.tanh %132 : vector<2x64xf32>
    %134 = arith.mulf %129, %133 : vector<2x64xf32>
    %c7 = arith.constant 7 : index
    %c0_34 = arith.constant 0 : index
    %c0_35 = arith.constant 0 : index
    %135 = vector.load %arg3[%c7, %c0_34, %c0_35] : memref<20x2x256xf32, #tpu.memory_space<vmem>>, vector<1x2x256xf32>
    %136 = vector.shape_cast %135 : vector<1x2x256xf32> to vector<2x256xf32>
    %cst_36 = arith.constant dense<0.000000e+00> : vector<2x256xf32>
    %137 = tpu.matmul %134, %11, %cst_36 {dimension_numbers = #tpu.dot_dimension_numbers<[1], [0], [0], [1], [0, 0, 1, 1], [], []>} : vector<2x64xf32>, vector<64x256xf32>, vector<2x256xf32> -> vector<2x256xf32>
    %138 = arith.addf %136, %137 : vector<2x256xf32>
    %139 = math.tanh %138 : vector<2x256xf32>
    %140 = arith.mulf %139, %20 : vector<2x256xf32>
    %141 = arith.addf %140, %23 : vector<2x256xf32>
    %142 = vector.extract_strided_slice %141 {offsets = [0, 0], sizes = [2, 64], strides = [1, 1]} : vector<2x256xf32> to vector<2x64xf32>
    %143 = vector.extract_strided_slice %141 {offsets = [0, 64], sizes = [2, 64], strides = [1, 1]} : vector<2x256xf32> to vector<2x64xf32>
    %144 = vector.extract_strided_slice %141 {offsets = [0, 128], sizes = [2, 64], strides = [1, 1]} : vector<2x256xf32> to vector<2x64xf32>
    %145 = vector.extract_strided_slice %141 {offsets = [0, 192], sizes = [2, 64], strides = [1, 1]} : vector<2x256xf32> to vector<2x64xf32>
    %146 = arith.mulf %143, %132 : vector<2x64xf32>
    %147 = arith.mulf %142, %144 : vector<2x64xf32>
    %148 = arith.addf %146, %147 : vector<2x64xf32>
    %149 = math.tanh %148 : vector<2x64xf32>
    %150 = arith.mulf %145, %149 : vector<2x64xf32>
    %c8 = arith.constant 8 : index
    %c0_37 = arith.constant 0 : index
    %c0_38 = arith.constant 0 : index
    %151 = vector.load %arg3[%c8, %c0_37, %c0_38] : memref<20x2x256xf32, #tpu.memory_space<vmem>>, vector<1x2x256xf32>
    %152 = vector.shape_cast %151 : vector<1x2x256xf32> to vector<2x256xf32>
    %cst_39 = arith.constant dense<0.000000e+00> : vector<2x256xf32>
    %153 = tpu.matmul %150, %11, %cst_39 {dimension_numbers = #tpu.dot_dimension_numbers<[1], [0], [0], [1], [0, 0, 1, 1], [], []>} : vector<2x64xf32>, vector<64x256xf32>, vector<2x256xf32> -> vector<2x256xf32>
    %154 = arith.addf %152, %153 : vector<2x256xf32>
    %155 = math.tanh %154 : vector<2x256xf32>
    %156 = arith.mulf %155, %20 : vector<2x256xf32>
    %157 = arith.addf %156, %23 : vector<2x256xf32>
    %158 = vector.extract_strided_slice %157 {offsets = [0, 0], sizes = [2, 64], strides = [1, 1]} : vector<2x256xf32> to vector<2x64xf32>
    %159 = vector.extract_strided_slice %157 {offsets = [0, 64], sizes = [2, 64], strides = [1, 1]} : vector<2x256xf32> to vector<2x64xf32>
    %160 = vector.extract_strided_slice %157 {offsets = [0, 128], sizes = [2, 64], strides = [1, 1]} : vector<2x256xf32> to vector<2x64xf32>
    %161 = vector.extract_strided_slice %157 {offsets = [0, 192], sizes = [2, 64], strides = [1, 1]} : vector<2x256xf32> to vector<2x64xf32>
    %162 = arith.mulf %159, %148 : vector<2x64xf32>
    %163 = arith.mulf %158, %160 : vector<2x64xf32>
    %164 = arith.addf %162, %163 : vector<2x64xf32>
    %165 = math.tanh %164 : vector<2x64xf32>
    %166 = arith.mulf %161, %165 : vector<2x64xf32>
    %c9 = arith.constant 9 : index
    %c0_40 = arith.constant 0 : index
    %c0_41 = arith.constant 0 : index
    %167 = vector.load %arg3[%c9, %c0_40, %c0_41] : memref<20x2x256xf32, #tpu.memory_space<vmem>>, vector<1x2x256xf32>
    %168 = vector.shape_cast %167 : vector<1x2x256xf32> to vector<2x256xf32>
    %cst_42 = arith.constant dense<0.000000e+00> : vector<2x256xf32>
    %169 = tpu.matmul %166, %11, %cst_42 {dimension_numbers = #tpu.dot_dimension_numbers<[1], [0], [0], [1], [0, 0, 1, 1], [], []>} : vector<2x64xf32>, vector<64x256xf32>, vector<2x256xf32> -> vector<2x256xf32>
    %170 = arith.addf %168, %169 : vector<2x256xf32>
    %171 = math.tanh %170 : vector<2x256xf32>
    %172 = arith.mulf %171, %20 : vector<2x256xf32>
    %173 = arith.addf %172, %23 : vector<2x256xf32>
    %174 = vector.extract_strided_slice %173 {offsets = [0, 0], sizes = [2, 64], strides = [1, 1]} : vector<2x256xf32> to vector<2x64xf32>
    %175 = vector.extract_strided_slice %173 {offsets = [0, 64], sizes = [2, 64], strides = [1, 1]} : vector<2x256xf32> to vector<2x64xf32>
    %176 = vector.extract_strided_slice %173 {offsets = [0, 128], sizes = [2, 64], strides = [1, 1]} : vector<2x256xf32> to vector<2x64xf32>
    %177 = vector.extract_strided_slice %173 {offsets = [0, 192], sizes = [2, 64], strides = [1, 1]} : vector<2x256xf32> to vector<2x64xf32>
    %178 = arith.mulf %175, %164 : vector<2x64xf32>
    %179 = arith.mulf %174, %176 : vector<2x64xf32>
    %180 = arith.addf %178, %179 : vector<2x64xf32>
    %181 = math.tanh %180 : vector<2x64xf32>
    %182 = arith.mulf %177, %181 : vector<2x64xf32>
    %c10 = arith.constant 10 : index
    %c0_43 = arith.constant 0 : index
    %c0_44 = arith.constant 0 : index
    %183 = vector.load %arg3[%c10, %c0_43, %c0_44] : memref<20x2x256xf32, #tpu.memory_space<vmem>>, vector<1x2x256xf32>
    %184 = vector.shape_cast %183 : vector<1x2x256xf32> to vector<2x256xf32>
    %cst_45 = arith.constant dense<0.000000e+00> : vector<2x256xf32>
    %185 = tpu.matmul %182, %11, %cst_45 {dimension_numbers = #tpu.dot_dimension_numbers<[1], [0], [0], [1], [0, 0, 1, 1], [], []>} : vector<2x64xf32>, vector<64x256xf32>, vector<2x256xf32> -> vector<2x256xf32>
    %186 = arith.addf %184, %185 : vector<2x256xf32>
    %187 = math.tanh %186 : vector<2x256xf32>
    %188 = arith.mulf %187, %20 : vector<2x256xf32>
    %189 = arith.addf %188, %23 : vector<2x256xf32>
    %190 = vector.extract_strided_slice %189 {offsets = [0, 0], sizes = [2, 64], strides = [1, 1]} : vector<2x256xf32> to vector<2x64xf32>
    %191 = vector.extract_strided_slice %189 {offsets = [0, 64], sizes = [2, 64], strides = [1, 1]} : vector<2x256xf32> to vector<2x64xf32>
    %192 = vector.extract_strided_slice %189 {offsets = [0, 128], sizes = [2, 64], strides = [1, 1]} : vector<2x256xf32> to vector<2x64xf32>
    %193 = vector.extract_strided_slice %189 {offsets = [0, 192], sizes = [2, 64], strides = [1, 1]} : vector<2x256xf32> to vector<2x64xf32>
    %194 = arith.mulf %191, %180 : vector<2x64xf32>
    %195 = arith.mulf %190, %192 : vector<2x64xf32>
    %196 = arith.addf %194, %195 : vector<2x64xf32>
    %197 = math.tanh %196 : vector<2x64xf32>
    %198 = arith.mulf %193, %197 : vector<2x64xf32>
    %c11 = arith.constant 11 : index
    %c0_46 = arith.constant 0 : index
    %c0_47 = arith.constant 0 : index
    %199 = vector.load %arg3[%c11, %c0_46, %c0_47] : memref<20x2x256xf32, #tpu.memory_space<vmem>>, vector<1x2x256xf32>
    %200 = vector.shape_cast %199 : vector<1x2x256xf32> to vector<2x256xf32>
    %cst_48 = arith.constant dense<0.000000e+00> : vector<2x256xf32>
    %201 = tpu.matmul %198, %11, %cst_48 {dimension_numbers = #tpu.dot_dimension_numbers<[1], [0], [0], [1], [0, 0, 1, 1], [], []>} : vector<2x64xf32>, vector<64x256xf32>, vector<2x256xf32> -> vector<2x256xf32>
    %202 = arith.addf %200, %201 : vector<2x256xf32>
    %203 = math.tanh %202 : vector<2x256xf32>
    %204 = arith.mulf %203, %20 : vector<2x256xf32>
    %205 = arith.addf %204, %23 : vector<2x256xf32>
    %206 = vector.extract_strided_slice %205 {offsets = [0, 0], sizes = [2, 64], strides = [1, 1]} : vector<2x256xf32> to vector<2x64xf32>
    %207 = vector.extract_strided_slice %205 {offsets = [0, 64], sizes = [2, 64], strides = [1, 1]} : vector<2x256xf32> to vector<2x64xf32>
    %208 = vector.extract_strided_slice %205 {offsets = [0, 128], sizes = [2, 64], strides = [1, 1]} : vector<2x256xf32> to vector<2x64xf32>
    %209 = vector.extract_strided_slice %205 {offsets = [0, 192], sizes = [2, 64], strides = [1, 1]} : vector<2x256xf32> to vector<2x64xf32>
    %210 = arith.mulf %207, %196 : vector<2x64xf32>
    %211 = arith.mulf %206, %208 : vector<2x64xf32>
    %212 = arith.addf %210, %211 : vector<2x64xf32>
    %213 = math.tanh %212 : vector<2x64xf32>
    %214 = arith.mulf %209, %213 : vector<2x64xf32>
    %c12 = arith.constant 12 : index
    %c0_49 = arith.constant 0 : index
    %c0_50 = arith.constant 0 : index
    %215 = vector.load %arg3[%c12, %c0_49, %c0_50] : memref<20x2x256xf32, #tpu.memory_space<vmem>>, vector<1x2x256xf32>
    %216 = vector.shape_cast %215 : vector<1x2x256xf32> to vector<2x256xf32>
    %cst_51 = arith.constant dense<0.000000e+00> : vector<2x256xf32>
    %217 = tpu.matmul %214, %11, %cst_51 {dimension_numbers = #tpu.dot_dimension_numbers<[1], [0], [0], [1], [0, 0, 1, 1], [], []>} : vector<2x64xf32>, vector<64x256xf32>, vector<2x256xf32> -> vector<2x256xf32>
    %218 = arith.addf %216, %217 : vector<2x256xf32>
    %219 = math.tanh %218 : vector<2x256xf32>
    %220 = arith.mulf %219, %20 : vector<2x256xf32>
    %221 = arith.addf %220, %23 : vector<2x256xf32>
    %222 = vector.extract_strided_slice %221 {offsets = [0, 0], sizes = [2, 64], strides = [1, 1]} : vector<2x256xf32> to vector<2x64xf32>
    %223 = vector.extract_strided_slice %221 {offsets = [0, 64], sizes = [2, 64], strides = [1, 1]} : vector<2x256xf32> to vector<2x64xf32>
    %224 = vector.extract_strided_slice %221 {offsets = [0, 128], sizes = [2, 64], strides = [1, 1]} : vector<2x256xf32> to vector<2x64xf32>
    %225 = vector.extract_strided_slice %221 {offsets = [0, 192], sizes = [2, 64], strides = [1, 1]} : vector<2x256xf32> to vector<2x64xf32>
    %226 = arith.mulf %223, %212 : vector<2x64xf32>
    %227 = arith.mulf %222, %224 : vector<2x64xf32>
    %228 = arith.addf %226, %227 : vector<2x64xf32>
    %229 = math.tanh %228 : vector<2x64xf32>
    %230 = arith.mulf %225, %229 : vector<2x64xf32>
    %c13 = arith.constant 13 : index
    %c0_52 = arith.constant 0 : index
    %c0_53 = arith.constant 0 : index
    %231 = vector.load %arg3[%c13, %c0_52, %c0_53] : memref<20x2x256xf32, #tpu.memory_space<vmem>>, vector<1x2x256xf32>
    %232 = vector.shape_cast %231 : vector<1x2x256xf32> to vector<2x256xf32>
    %cst_54 = arith.constant dense<0.000000e+00> : vector<2x256xf32>
    %233 = tpu.matmul %230, %11, %cst_54 {dimension_numbers = #tpu.dot_dimension_numbers<[1], [0], [0], [1], [0, 0, 1, 1], [], []>} : vector<2x64xf32>, vector<64x256xf32>, vector<2x256xf32> -> vector<2x256xf32>
    %234 = arith.addf %232, %233 : vector<2x256xf32>
    %235 = math.tanh %234 : vector<2x256xf32>
    %236 = arith.mulf %235, %20 : vector<2x256xf32>
    %237 = arith.addf %236, %23 : vector<2x256xf32>
    %238 = vector.extract_strided_slice %237 {offsets = [0, 0], sizes = [2, 64], strides = [1, 1]} : vector<2x256xf32> to vector<2x64xf32>
    %239 = vector.extract_strided_slice %237 {offsets = [0, 64], sizes = [2, 64], strides = [1, 1]} : vector<2x256xf32> to vector<2x64xf32>
    %240 = vector.extract_strided_slice %237 {offsets = [0, 128], sizes = [2, 64], strides = [1, 1]} : vector<2x256xf32> to vector<2x64xf32>
    %241 = vector.extract_strided_slice %237 {offsets = [0, 192], sizes = [2, 64], strides = [1, 1]} : vector<2x256xf32> to vector<2x64xf32>
    %242 = arith.mulf %239, %228 : vector<2x64xf32>
    %243 = arith.mulf %238, %240 : vector<2x64xf32>
    %244 = arith.addf %242, %243 : vector<2x64xf32>
    %245 = math.tanh %244 : vector<2x64xf32>
    %246 = arith.mulf %241, %245 : vector<2x64xf32>
    %c14 = arith.constant 14 : index
    %c0_55 = arith.constant 0 : index
    %c0_56 = arith.constant 0 : index
    %247 = vector.load %arg3[%c14, %c0_55, %c0_56] : memref<20x2x256xf32, #tpu.memory_space<vmem>>, vector<1x2x256xf32>
    %248 = vector.shape_cast %247 : vector<1x2x256xf32> to vector<2x256xf32>
    %cst_57 = arith.constant dense<0.000000e+00> : vector<2x256xf32>
    %249 = tpu.matmul %246, %11, %cst_57 {dimension_numbers = #tpu.dot_dimension_numbers<[1], [0], [0], [1], [0, 0, 1, 1], [], []>} : vector<2x64xf32>, vector<64x256xf32>, vector<2x256xf32> -> vector<2x256xf32>
    %250 = arith.addf %248, %249 : vector<2x256xf32>
    %251 = math.tanh %250 : vector<2x256xf32>
    %252 = arith.mulf %251, %20 : vector<2x256xf32>
    %253 = arith.addf %252, %23 : vector<2x256xf32>
    %254 = vector.extract_strided_slice %253 {offsets = [0, 0], sizes = [2, 64], strides = [1, 1]} : vector<2x256xf32> to vector<2x64xf32>
    %255 = vector.extract_strided_slice %253 {offsets = [0, 64], sizes = [2, 64], strides = [1, 1]} : vector<2x256xf32> to vector<2x64xf32>
    %256 = vector.extract_strided_slice %253 {offsets = [0, 128], sizes = [2, 64], strides = [1, 1]} : vector<2x256xf32> to vector<2x64xf32>
    %257 = vector.extract_strided_slice %253 {offsets = [0, 192], sizes = [2, 64], strides = [1, 1]} : vector<2x256xf32> to vector<2x64xf32>
    %258 = arith.mulf %255, %244 : vector<2x64xf32>
    %259 = arith.mulf %254, %256 : vector<2x64xf32>
    %260 = arith.addf %258, %259 : vector<2x64xf32>
    %261 = math.tanh %260 : vector<2x64xf32>
    %262 = arith.mulf %257, %261 : vector<2x64xf32>
    %c15 = arith.constant 15 : index
    %c0_58 = arith.constant 0 : index
    %c0_59 = arith.constant 0 : index
    %263 = vector.load %arg3[%c15, %c0_58, %c0_59] : memref<20x2x256xf32, #tpu.memory_space<vmem>>, vector<1x2x256xf32>
    %264 = vector.shape_cast %263 : vector<1x2x256xf32> to vector<2x256xf32>
    %cst_60 = arith.constant dense<0.000000e+00> : vector<2x256xf32>
    %265 = tpu.matmul %262, %11, %cst_60 {dimension_numbers = #tpu.dot_dimension_numbers<[1], [0], [0], [1], [0, 0, 1, 1], [], []>} : vector<2x64xf32>, vector<64x256xf32>, vector<2x256xf32> -> vector<2x256xf32>
    %266 = arith.addf %264, %265 : vector<2x256xf32>
    %267 = math.tanh %266 : vector<2x256xf32>
    %268 = arith.mulf %267, %20 : vector<2x256xf32>
    %269 = arith.addf %268, %23 : vector<2x256xf32>
    %270 = vector.extract_strided_slice %269 {offsets = [0, 0], sizes = [2, 64], strides = [1, 1]} : vector<2x256xf32> to vector<2x64xf32>
    %271 = vector.extract_strided_slice %269 {offsets = [0, 64], sizes = [2, 64], strides = [1, 1]} : vector<2x256xf32> to vector<2x64xf32>
    %272 = vector.extract_strided_slice %269 {offsets = [0, 128], sizes = [2, 64], strides = [1, 1]} : vector<2x256xf32> to vector<2x64xf32>
    %273 = vector.extract_strided_slice %269 {offsets = [0, 192], sizes = [2, 64], strides = [1, 1]} : vector<2x256xf32> to vector<2x64xf32>
    %274 = arith.mulf %271, %260 : vector<2x64xf32>
    %275 = arith.mulf %270, %272 : vector<2x64xf32>
    %276 = arith.addf %274, %275 : vector<2x64xf32>
    %277 = math.tanh %276 : vector<2x64xf32>
    %278 = arith.mulf %273, %277 : vector<2x64xf32>
    %c16 = arith.constant 16 : index
    %c0_61 = arith.constant 0 : index
    %c0_62 = arith.constant 0 : index
    %279 = vector.load %arg3[%c16, %c0_61, %c0_62] : memref<20x2x256xf32, #tpu.memory_space<vmem>>, vector<1x2x256xf32>
    %280 = vector.shape_cast %279 : vector<1x2x256xf32> to vector<2x256xf32>
    %cst_63 = arith.constant dense<0.000000e+00> : vector<2x256xf32>
    %281 = tpu.matmul %278, %11, %cst_63 {dimension_numbers = #tpu.dot_dimension_numbers<[1], [0], [0], [1], [0, 0, 1, 1], [], []>} : vector<2x64xf32>, vector<64x256xf32>, vector<2x256xf32> -> vector<2x256xf32>
    %282 = arith.addf %280, %281 : vector<2x256xf32>
    %283 = math.tanh %282 : vector<2x256xf32>
    %284 = arith.mulf %283, %20 : vector<2x256xf32>
    %285 = arith.addf %284, %23 : vector<2x256xf32>
    %286 = vector.extract_strided_slice %285 {offsets = [0, 0], sizes = [2, 64], strides = [1, 1]} : vector<2x256xf32> to vector<2x64xf32>
    %287 = vector.extract_strided_slice %285 {offsets = [0, 64], sizes = [2, 64], strides = [1, 1]} : vector<2x256xf32> to vector<2x64xf32>
    %288 = vector.extract_strided_slice %285 {offsets = [0, 128], sizes = [2, 64], strides = [1, 1]} : vector<2x256xf32> to vector<2x64xf32>
    %289 = vector.extract_strided_slice %285 {offsets = [0, 192], sizes = [2, 64], strides = [1, 1]} : vector<2x256xf32> to vector<2x64xf32>
    %290 = arith.mulf %287, %276 : vector<2x64xf32>
    %291 = arith.mulf %286, %288 : vector<2x64xf32>
    %292 = arith.addf %290, %291 : vector<2x64xf32>
    %293 = math.tanh %292 : vector<2x64xf32>
    %294 = arith.mulf %289, %293 : vector<2x64xf32>
    %c17 = arith.constant 17 : index
    %c0_64 = arith.constant 0 : index
    %c0_65 = arith.constant 0 : index
    %295 = vector.load %arg3[%c17, %c0_64, %c0_65] : memref<20x2x256xf32, #tpu.memory_space<vmem>>, vector<1x2x256xf32>
    %296 = vector.shape_cast %295 : vector<1x2x256xf32> to vector<2x256xf32>
    %cst_66 = arith.constant dense<0.000000e+00> : vector<2x256xf32>
    %297 = tpu.matmul %294, %11, %cst_66 {dimension_numbers = #tpu.dot_dimension_numbers<[1], [0], [0], [1], [0, 0, 1, 1], [], []>} : vector<2x64xf32>, vector<64x256xf32>, vector<2x256xf32> -> vector<2x256xf32>
    %298 = arith.addf %296, %297 : vector<2x256xf32>
    %299 = math.tanh %298 : vector<2x256xf32>
    %300 = arith.mulf %299, %20 : vector<2x256xf32>
    %301 = arith.addf %300, %23 : vector<2x256xf32>
    %302 = vector.extract_strided_slice %301 {offsets = [0, 0], sizes = [2, 64], strides = [1, 1]} : vector<2x256xf32> to vector<2x64xf32>
    %303 = vector.extract_strided_slice %301 {offsets = [0, 64], sizes = [2, 64], strides = [1, 1]} : vector<2x256xf32> to vector<2x64xf32>
    %304 = vector.extract_strided_slice %301 {offsets = [0, 128], sizes = [2, 64], strides = [1, 1]} : vector<2x256xf32> to vector<2x64xf32>
    %305 = vector.extract_strided_slice %301 {offsets = [0, 192], sizes = [2, 64], strides = [1, 1]} : vector<2x256xf32> to vector<2x64xf32>
    %306 = arith.mulf %303, %292 : vector<2x64xf32>
    %307 = arith.mulf %302, %304 : vector<2x64xf32>
    %308 = arith.addf %306, %307 : vector<2x64xf32>
    %309 = math.tanh %308 : vector<2x64xf32>
    %310 = arith.mulf %305, %309 : vector<2x64xf32>
    %c18 = arith.constant 18 : index
    %c0_67 = arith.constant 0 : index
    %c0_68 = arith.constant 0 : index
    %311 = vector.load %arg3[%c18, %c0_67, %c0_68] : memref<20x2x256xf32, #tpu.memory_space<vmem>>, vector<1x2x256xf32>
    %312 = vector.shape_cast %311 : vector<1x2x256xf32> to vector<2x256xf32>
    %cst_69 = arith.constant dense<0.000000e+00> : vector<2x256xf32>
    %313 = tpu.matmul %310, %11, %cst_69 {dimension_numbers = #tpu.dot_dimension_numbers<[1], [0], [0], [1], [0, 0, 1, 1], [], []>} : vector<2x64xf32>, vector<64x256xf32>, vector<2x256xf32> -> vector<2x256xf32>
    %314 = arith.addf %312, %313 : vector<2x256xf32>
    %315 = math.tanh %314 : vector<2x256xf32>
    %316 = arith.mulf %315, %20 : vector<2x256xf32>
    %317 = arith.addf %316, %23 : vector<2x256xf32>
    %318 = vector.extract_strided_slice %317 {offsets = [0, 0], sizes = [2, 64], strides = [1, 1]} : vector<2x256xf32> to vector<2x64xf32>
    %319 = vector.extract_strided_slice %317 {offsets = [0, 64], sizes = [2, 64], strides = [1, 1]} : vector<2x256xf32> to vector<2x64xf32>
    %320 = vector.extract_strided_slice %317 {offsets = [0, 128], sizes = [2, 64], strides = [1, 1]} : vector<2x256xf32> to vector<2x64xf32>
    %321 = vector.extract_strided_slice %317 {offsets = [0, 192], sizes = [2, 64], strides = [1, 1]} : vector<2x256xf32> to vector<2x64xf32>
    %322 = arith.mulf %319, %308 : vector<2x64xf32>
    %323 = arith.mulf %318, %320 : vector<2x64xf32>
    %324 = arith.addf %322, %323 : vector<2x64xf32>
    %325 = math.tanh %324 : vector<2x64xf32>
    %326 = arith.mulf %321, %325 : vector<2x64xf32>
    %c19 = arith.constant 19 : index
    %c0_70 = arith.constant 0 : index
    %c0_71 = arith.constant 0 : index
    %327 = vector.load %arg3[%c19, %c0_70, %c0_71] : memref<20x2x256xf32, #tpu.memory_space<vmem>>, vector<1x2x256xf32>
    %328 = vector.shape_cast %327 : vector<1x2x256xf32> to vector<2x256xf32>
    %cst_72 = arith.constant dense<0.000000e+00> : vector<2x256xf32>
    %329 = tpu.matmul %326, %11, %cst_72 {dimension_numbers = #tpu.dot_dimension_numbers<[1], [0], [0], [1], [0, 0, 1, 1], [], []>} : vector<2x64xf32>, vector<64x256xf32>, vector<2x256xf32> -> vector<2x256xf32>
    %330 = arith.addf %328, %329 : vector<2x256xf32>
    %331 = math.tanh %330 : vector<2x256xf32>
    %332 = arith.mulf %331, %20 : vector<2x256xf32>
    %333 = arith.addf %332, %23 : vector<2x256xf32>
    %334 = vector.extract_strided_slice %333 {offsets = [0, 0], sizes = [2, 64], strides = [1, 1]} : vector<2x256xf32> to vector<2x64xf32>
    %335 = vector.extract_strided_slice %333 {offsets = [0, 64], sizes = [2, 64], strides = [1, 1]} : vector<2x256xf32> to vector<2x64xf32>
    %336 = vector.extract_strided_slice %333 {offsets = [0, 128], sizes = [2, 64], strides = [1, 1]} : vector<2x256xf32> to vector<2x64xf32>
    %337 = vector.extract_strided_slice %333 {offsets = [0, 192], sizes = [2, 64], strides = [1, 1]} : vector<2x256xf32> to vector<2x64xf32>
    %338 = arith.mulf %335, %324 : vector<2x64xf32>
    %339 = arith.mulf %334, %336 : vector<2x64xf32>
    %340 = arith.addf %338, %339 : vector<2x64xf32>
    %341 = math.tanh %340 : vector<2x64xf32>
    %342 = arith.mulf %337, %341 : vector<2x64xf32>
    %c64 = arith.constant 64 : index
    %c0_73 = arith.constant 0 : index
    %343 = vector.load %arg1[%c64, %c0_73] : memref<131x256xf32, #tpu.memory_space<vmem>>, vector<64x256xf32>
    %c130 = arith.constant 130 : index
    %c0_74 = arith.constant 0 : index
    %344 = vector.load %arg1[%c130, %c0_74] : memref<131x256xf32, #tpu.memory_space<vmem>>, vector<1x256xf32>
    %cst_75 = arith.constant dense<0.000000e+00> : vector<2x256xf32>
    %345 = tpu.matmul %342, %343, %cst_75 {dimension_numbers = #tpu.dot_dimension_numbers<[1], [0], [0], [1], [0, 0, 1, 1], [], []>} : vector<2x64xf32>, vector<64x256xf32>, vector<2x256xf32> -> vector<2x256xf32>
    %346 = vector.broadcast %344 : vector<1x256xf32> to vector<2x256xf32>
    %347 = arith.addf %345, %346 : vector<2x256xf32>
    %348 = vector.extract_strided_slice %347 {offsets = [0, 0], sizes = [2, 5], strides = [1, 1]} : vector<2x256xf32> to vector<2x5xf32>
    %c0_76 = arith.constant 0 : index
    %c0_77 = arith.constant 0 : index
    %349 = vector.load %arg2[%c0_76, %c0_77] : memref<2x5xf32, #tpu.memory_space<vmem>>, vector<2x5xf32>
    tpu.vector_store %arg2[%c0_76, %c0_77], %348 {strides = array<i32>} : memref<2x5xf32, #tpu.memory_space<vmem>>, vector<2x5xf32>,
    return
  }
}

</mosaic_0001>

<bundles_post_ra>
// kernel: lstm_forward.1
= control target key start
LH: loop header
LB: loop body
LE: loop exit
PB: predicated region body
PF: predicated region fallthrough
CT: control target
= control target key end

     0   :  { %7 = vsyncpa [#allocation4], 0  ;;  %s3825_s0 = inlined_call_operand.vmem [shape: f32[20,2,1], index: 0, kind: input, shape index: {}]   ;;  %s3826_s1 = inlined_call_operand.hbm [shape: f32[131,256], index: 1, kind: input, shape index: {}]   ;;  %s3827_s2 = inlined_call_operand.hbm [shape: f32[2,5], index: 2, kind: output, shape index: {}]  }
   0x1   :  { %8 = vsyncpa [#allocation5], 0  ;;  %s3289_s9 = smov [#allocation3]   ;;  %s3241_s13 = scalar_lea.hbm %s3826_s1, 4352 }
   0x2   :  { %s16_s10 = sshll.u32 %s3289_s9, 4  ;;  %p3242_p0 = scmp.ne.s32.totalorder %s3826_s1, %s3241_s13  ;;  %s17_s10 = int_to_ptr.vmem [resolvable:$true] %s16_s10 }
   0x3   :  { %p3245_p1 = scmp.lt.u32.totalorder %s3241_s13, %s3826_s1 }
   0x5   :  { %p3247_p2 = pnand %p3245_p1, %p3242_p0 }
   0x7   :  { %3250 = shalt.err (!%p3247_p2)
}
   0x8   :  { %s3251_s18 = scalar_lea.vmem %s17_s10, 4352  ;;  %p3256_p4 = scmp.lt.s32.totalorder %s17_s10, %s17_s10 }
   0x9   :  { %p3252_p3 = scmp.ne.s32.totalorder %s17_s10, %s3251_s18  ;;  %p3257_p5 = scmp.lt.s32.totalorder %s3251_s18, %s3251_s18 }
   0xb   :  { %p3258_p6 = por %p3257_p5, %p3256_p4 }
   0xd   :  { %p3259_p7 = pnand %p3258_p6, %p3252_p3 }
   0xf   :  { %3262 = shalt.err (!%p3259_p7)
}
  0x10   :  { %s3290_s19 = smov 256   ;;  %s3291_s20 = smov 16  }
  0x11   :  { %22 = dma.hbm_to_vmem [thread:$0]  %s3826_s1, 4352, %s17_s10, [#allocation4], %s3290_s19, %s3290_s19, %s3291_s20  }
  0x12   :  { %3285 = dma.done.wait [#allocation4], 4352  }
  0x13   :  { %3286 = vsyncadd [#allocation4], 4294962944  ;;  %v3292_v0 = vmov 0   ;;  %v30_v1 = vld [vmem:[%s3825_s0] sm:$0x3]  ;;  %v151_v2 = vlaneseq  ;;  %v3294_v24 = vmov 0.5  }
  0x14   :  { %3160 = vset.pattern.permute.xlu0 %v3292_v0  ;;  %v27_v6 = vld [vmem:[#allocation3 + $0x100] ss:$8 sm:$0x3]  ;;  %v29_v7 = vld [vmem:[#allocation3 + $0x101] ss:$8 sm:$0x3] }
  0x15   :  { %52 = vperm.xlu0 %3160, %v30_v1   ;;  %v152_v3 = vshrl.u32 %v151_v2, 7  ;;  %v509_v17 = vand.u32 127, %v151_v2  ;;  %v3293_v20 = vmov 1983009808   ;;  %s3295_s1 = smov 64   ;;  %v493_v38 = vld [vmem:[#allocation3 + $0x8] sm:$0xff] }
  0x16   :  { %v527_v21 = vunpack.c.l.s4 %v3293_v20  ;;  %v31_v37 = vld [vmem:[%s3825_s0 + $0x2] sm:$0x3]  ;;  %v495_v39 = vld [vmem:[#allocation3 + $0x18] sm:$0xff]  ;;  %v492_v40 = vld [vmem:[#allocation3] sm:$0xff]  ;;  %v3296_v1 = vmov 0.0   ;;  %vm569_vm1 = vcmask 523264  }
  0x17   :  { %v3328_v4 = vsub.s32 0, %v152_v3  ;;  %v157_v5 = vsub.s32 1, %v152_v3  ;;  %v510_v19 = vadd.s32 128, %v509_v17  ;;  %v3359_v41 = vpack.c.bf16 %v495_v39, %v493_v38  ;;  %v494_v42 = vld [vmem:[#allocation3 + $0x10] sm:$0xff]  ;;  %v497_v43 = vld [vmem:[#allocation3 + $0x28] sm:$0xff]  ;;  %v499_v44 = vld [vmem:[#allocation3 + $0x38] sm:$0xff]  ;;  %637 = vmatprep.mubr.f32.mxu0 %v3296_v1  ;;  %748 = vmatprep.mubr.f32.mxu1 %v3296_v1 }
  0x18   :  { %v528_v23 = vunpack.c.0.s8 %v527_v21  ;;  %v3361_v45 = vpack.c.bf16 %v494_v42, %v492_v40  ;;  %v3363_v46 = vpack.c.bf16 %v499_v44, %v497_v43  ;;  %v496_v47 = vld [vmem:[#allocation3 + $0x20] sm:$0xff]  ;;  %v498_v48 = vld [vmem:[#allocation3 + $0x30] sm:$0xff]  ;;  %v501_v49 = vld [vmem:[#allocation3 + $0x48] sm:$0xff]  ;;  %vm2774_vm2 = vcmask 33792  }
  0x19   :  { %v3331_v8 = vrot.slane %v27_v6, %v3328_v4  ;;  %v3333_v9 = vrot.slane %v27_v6, %v157_v5  ;;  %v3336_v10 = vrot.slane %v29_v7, %v3328_v4  ;;  %v3338_v11 = vrot.slane %v29_v7, %v157_v5  ;;  %2832 = vmatprep.subr.bf16.mxu0 %v3359_v41  ;;  %v503_v50 = vld [vmem:[#allocation3 + $0x58] sm:$0xff]  ;;  %v500_v53 = vld [vmem:[#allocation3 + $0x40] sm:$0xff]  ;;  %v502_v54 = vld [vmem:[#allocation3 + $0x50] sm:$0xff] }
  0x1a   :  { %vm514_vm0 = vcmp.lt.s32.totalorder %v510_v19, 192  ;;  %v3344_v28 = vsub.s32 %v528_v23, %v152_v3  ;;  %2848 = vmatprep.subr.bf16.mxu1 %v3359_v41  ;;  %2834 = vmatpush1.bf16.msra.mxu0 %v3361_v45  ;;  %v3368_v51 = vpack.c.bf16 %v498_v48, %v496_v47  ;;  %v3372_v52 = vpack.c.bf16 %v503_v50, %v501_v49  ;;  %v505_v55 = vld [vmem:[#allocation3 + $0x68] sm:$0xff]  ;;  %v507_v56 = vld [vmem:[#allocation3 + $0x78] sm:$0xff]  ;;  %v504_v59 = vld [vmem:[#allocation3 + $0x60] sm:$0xff] }
  0x1b   :  { %v518_v25 = vsel %vm514_vm0, 1.0, %v3294_v24  ;;  %v520_v26 = vsel %vm514_vm0, 0.0, %v3294_v24  ;;  %2850 = vmatpush1.bf16.msra.mxu1 %v3361_v45  ;;  %2836 = vmatprep.subr.bf16.mxu0 %v3363_v46  ;;  %v3376_v57 = vpack.c.bf16 %v502_v54, %v500_v53  ;;  %v3380_v58 = vpack.c.bf16 %v507_v56, %v505_v55  ;;  %v506_v60 = vld [vmem:[#allocation3 + $0x70] sm:$0xff] }
  0x1c   :  { %v525_v27 = vcombine.low %v3294_v24, %v518_v25  ;;  %v537_v29 = vcombine.low %v3294_v24, %v520_v26  ;;  %2852 = vmatprep.subr.bf16.mxu1 %v3363_v46  ;;  %v3384_v61 = vpack.c.bf16 %v506_v60, %v504_v59 }
  0x1e   :  { %v3347_v30 = vrot.slane %v525_v27, %v3344_v28  ;;  %v3350_v31 = vrot.slane %v537_v29, %v3344_v28  ;;  %2838 = vmatpush1.bf16.msra.mxu0 %v3368_v51  ;;  %v32_v29 = vld [vmem:[%s3825_s0 + $0x4] sm:$0x3] }
  0x1f   :  { %2854 = vmatpush1.bf16.msra.mxu1 %v3368_v51  ;;  %2840 = vmatprep.subr.bf16.mxu0 %v3372_v52 }
  0x20   :  { %2856 = vmatprep.subr.bf16.mxu1 %v3372_v52 }
  0x22   :  { %2842 = vmatpush1.bf16.msra.mxu0 %v3376_v57 }
  0x23   :  { %2858 = vmatpush1.bf16.msra.mxu1 %v3376_v57  ;;  %2844 = vmatprep.subr.bf16.mxu0 %v3380_v58 }
  0x24   :  { %2860 = vmatprep.subr.bf16.mxu1 %v3380_v58 }
  0x26   :  { %2846 = vmatpush1.bf16.msra.mxu0 %v3384_v61 }
  0x27   :  { %2862 = vmatpush1.bf16.msra.mxu1 %v3384_v61  ;;  %2864 = vmatprep.subr.bf16.mxu0 %v3359_v41 }
  0x28   :  { %2880 = vmatprep.subr.bf16.mxu1 %v3359_v41 }
  0x94   :  { %v53_v12 = vpop.permute.xlu0 %52 }
  0x95   :  { %v161_v13 = vmul.f32 %v3331_v8, %v53_v12  ;;  %v162_v14 = vmul.f32 %v3333_v9, %v53_v12 }
  0x97   :  { %v212_v15 = vadd.f32 %v3336_v10, %v161_v13  ;;  %v213_v16 = vadd.f32 %v3338_v11, %v162_v14 }
  0x99   :  { %v292_v18 = vcombine.low %v212_v15, %v213_v16 }
  0x9b   :  { %2791 = vst.sshfl [vmem:[#allocation2] sm:$0x33 pattern:$0x76325410] %v292_v18 }
  0xa2   :  { %v521_v22 = vld [vmem:[#allocation2] sm:$0xf] }
  0xa3   :  { %3161 = vtanh.f32 %v521_v22 }
  0xad   :  { %v3162_v32 = vpop.eup %3161 }
  0xae   :  { %v534_v33 = vmul.f32 %v3162_v32, %v3347_v30 }
  0xb0   :  { %v546_v34 = vadd.f32 %v3350_v31, %v534_v33 }
  0xb2   :  { %558 = vrot.lane.b32.xlu1 %v546_v34, %s3295_s1  ;;  %v549_v35 = vrot.slane %v546_v34, 2  ;;  %v547_v62 = vmul.f32 0.0, %v546_v34 }
  0xb4   :  { %v551_v36 = vmul.f32 %v549_v35, %v546_v34 }
  0xb6   :  { %553 = vrot.lane.b32.xlu0 %v551_v36, %s3295_s1 }
  0xba   :  { %57 = vperm.xlu0 %3160, %v31_v37  }
 0x124   :  { %v559_v14 = vpop.permute.xlu1 %558 }
 0x125   :  { %v560_v15 = vrot.slane %v559_v14, 2 }
 0x128   :  { %v554_v63 = vpop.permute.xlu0 %553 }
 0x129   :  { %v556_v0 = vadd.f32 %v554_v63, %v547_v62 }
 0x12b   :  { %3163 = vtanh.f32 %v556_v0 }
 0x135   :  { %v3164_v2 = vpop.eup %3163 }
 0x136   :  { %563 = vrot.lane.b32.xlu1 %v3164_v2, %s3295_s1  ;;  %v33_v2 = vld [vmem:[%s3825_s0 + $0x6] sm:$0x3] }
 0x139   :  { %v58_v3 = vpop.permute.xlu0 %57 }
 0x13a   :  { %v163_v5 = vmul.f32 %v3331_v8, %v58_v3  ;;  %v164_v6 = vmul.f32 %v3333_v9, %v58_v3 }
 0x13c   :  { %v214_v7 = vadd.f32 %v3336_v10, %v163_v5  ;;  %v215_v12 = vadd.f32 %v3338_v11, %v164_v6 }
 0x13e   :  { %v300_v13 = vcombine.low %v214_v7, %v215_v12 }
 0x140   :  { %2792 = vst.sshfl [vmem:[#allocation2 + $0x4] sm:$0x33 pattern:$0x76325410] %v300_v13 }
 0x147   :  { %v568_v22 = vld [vmem:[#allocation2 + $0x4] sm:$0xf] }
 0x1a8   :  { %v564_v16 = vpop.permute.xlu1 %563 }
 0x1a9   :  { %v566_v17 = vmul.f32 %v564_v16, %v560_v15 }
 0x1ab   :  { %2811 = vmatmul.mubr.msk.f32.vlgmr.msra.gmra.mrb[0].mxu0 %vm569_vm1, %v566_v17 }
 0x1ac   :  { %2866 = vmatpush1.bf16.msra.mxu0 %v3361_v45  ;;  %859 = vmatprep.mubr.f32.mxu0 %v3296_v1 }
 0x1ad   :  { %2868 = vmatprep.subr.bf16.mxu0 %v3363_v46 }
 0x1b0   :  { %2870 = vmatpush1.bf16.msra.mxu0 %v3368_v51 }
 0x1b1   :  { %2872 = vmatprep.subr.bf16.mxu0 %v3372_v52 }
 0x1b4   :  { %2874 = vmatpush1.bf16.msra.mxu0 %v3376_v57 }
 0x1b5   :  { %2876 = vmatprep.subr.bf16.mxu0 %v3380_v58 }
 0x1b8   :  { %2878 = vmatpush1.bf16.msra.mxu0 %v3384_v61 }
 0x1b9   :  { %2896 = vmatprep.subr.bf16.mxu0 %v3359_v41 }
 0x27e   :  { %v639_v18 = vpop.f32.mrb[0].mxu0 }
 0x27f   :  { %v641_v19 = vpop.f32.mrb[1].mxu0 }
 0x280   :  { %v646_v20 = vcombine.low %v639_v18, %v641_v19 }
 0x282   :  { %v653_v21 = vrot.slane %v646_v20, %v3344_v28 }
 0x284   :  { %v655_v23 = vadd.f32 %v653_v21, %v568_v22 }
 0x286   :  { %3165 = vtanh.f32 %v655_v23 }
 0x290   :  { %v3166_v24 = vpop.eup %3165 }
 0x291   :  { %v657_v25 = vmul.f32 %v3166_v24, %v3347_v30 }
 0x293   :  { %v658_v26 = vadd.f32 %v657_v25, %v3350_v31 }
 0x295   :  { %670 = vrot.lane.b32.xlu0 %v658_v26, %s3295_s1  ;;  %v661_v27 = vrot.slane %v658_v26, 2  ;;  %v659_v33 = vmul.f32 %v658_v26, %v556_v0 }
 0x297   :  { %v663_v32 = vmul.f32 %v661_v27, %v658_v26 }
 0x299   :  { %62 = vperm.xlu0 %3160, %v32_v29   ;;  %665 = vrot.lane.b32.xlu1 %v663_v32, %s3295_s1 }
 0x307   :  { %v671_v36 = vpop.permute.xlu0 %670 }
 0x308   :  { %v672_v47 = vrot.slane %v671_v36, 2  ;;  %v34_v36 = vld [vmem:[%s3825_s0 + $0x8] sm:$0x3] }
 0x30b   :  { %v666_v34 = vpop.permute.xlu1 %665 }
 0x30c   :  { %v668_v35 = vadd.f32 %v666_v34, %v659_v33 }
 0x30e   :  { %3167 = vtanh.f32 %v668_v35 }
 0x318   :  { %v3168_v37 = vpop.eup %3167  ;;  %v63_v38 = vpop.permute.xlu0 %62 }
 0x319   :  { %v165_v39 = vmul.f32 %v3331_v8, %v63_v38  ;;  %v166_v40 = vmul.f32 %v3333_v9, %v63_v38  ;;  %675 = vrot.lane.b32.xlu1 %v3168_v37, %s3295_s1 }
 0x31b   :  { %v216_v42 = vadd.f32 %v3336_v10, %v165_v39  ;;  %v217_v43 = vadd.f32 %v3338_v11, %v166_v40 }
 0x31d   :  { %v308_v44 = vcombine.low %v216_v42, %v217_v43 }
 0x31f   :  { %2793 = vst.sshfl [vmem:[#allocation2 + $0x8] sm:$0x33 pattern:$0x76325410] %v308_v44 }
 0x326   :  { %v680_v56 = vld [vmem:[#allocation2 + $0x8] sm:$0xf] }
 0x38b   :  { %v676_v48 = vpop.permute.xlu1 %675 }
 0x38c   :  { %v678_v49 = vmul.f32 %v676_v48, %v672_v47 }
 0x38e   :  { %2812 = vmatmul.mubr.msk.f32.vlgmr.msra.gmra.mrb[0].mxu1 %vm569_vm1, %v678_v49 }
 0x38f   :  { %2882 = vmatpush1.bf16.msra.mxu1 %v3361_v45  ;;  %970 = vmatprep.mubr.f32.mxu1 %v3296_v1 }
 0x390   :  { %2884 = vmatprep.subr.bf16.mxu1 %v3363_v46 }
 0x393   :  { %2886 = vmatpush1.bf16.msra.mxu1 %v3368_v51 }
 0x394   :  { %2888 = vmatprep.subr.bf16.mxu1 %v3372_v52 }
 0x397   :  { %2890 = vmatpush1.bf16.msra.mxu1 %v3376_v57 }
 0x398   :  { %2892 = vmatprep.subr.bf16.mxu1 %v3380_v58 }
 0x39b   :  { %2894 = vmatpush1.bf16.msra.mxu1 %v3384_v61 }
 0x39c   :  { %2912 = vmatprep.subr.bf16.mxu1 %v3359_v41 }
 0x461   :  { %v750_v50 = vpop.f32.mrb[0].mxu1 }
 0x462   :  { %v752_v53 = vpop.f32.mrb[1].mxu1 }
 0x463   :  { %v757_v54 = vcombine.low %v750_v50, %v752_v53 }
 0x465   :  { %v764_v55 = vrot.slane %v757_v54, %v3344_v28 }
 0x467   :  { %v766_v59 = vadd.f32 %v764_v55, %v680_v56 }
 0x469   :  { %3169 = vtanh.f32 %v766_v59 }
 0x473   :  { %v3170_v60 = vpop.eup %3169 }
 0x474   :  { %v768_v62 = vmul.f32 %v3170_v60, %v3347_v30 }
 0x476   :  { %v769_v63 = vadd.f32 %v768_v62, %v3350_v31 }
 0x478   :  { %781 = vrot.lane.b32.xlu0 %v769_v63, %s3295_s1  ;;  %v772_v0 = vrot.slane %v769_v63, 2  ;;  %v770_v5 = vmul.f32 %v769_v63, %v668_v35 }
 0x47a   :  { %v774_v3 = vmul.f32 %v772_v0, %v769_v63 }
 0x47c   :  { %67 = vperm.xlu0 %3160, %v33_v2   ;;  %776 = vrot.lane.b32.xlu1 %v774_v3, %s3295_s1 }
 0x4ea   :  { %v782_v12 = vpop.permute.xlu0 %781 }
 0x4eb   :  { %v783_v20 = vrot.slane %v782_v12, 2  ;;  %v35_v12 = vld [vmem:[%s3825_s0 + $0xa] sm:$0x3] }
 0x4ee   :  { %v777_v6 = vpop.permute.xlu1 %776 }
 0x4ef   :  { %v779_v7 = vadd.f32 %v777_v6, %v770_v5 }
 0x4f1   :  { %3171 = vtanh.f32 %v779_v7 }
 0x4fb   :  { %v3172_v13 = vpop.eup %3171  ;;  %v68_v14 = vpop.permute.xlu0 %67 }
 0x4fc   :  { %v167_v15 = vmul.f32 %v3331_v8, %v68_v14  ;;  %v168_v16 = vmul.f32 %v3333_v9, %v68_v14  ;;  %786 = vrot.lane.b32.xlu1 %v3172_v13, %s3295_s1 }
 0x4fe   :  { %v218_v17 = vadd.f32 %v3336_v10, %v167_v15  ;;  %v219_v18 = vadd.f32 %v3338_v11, %v168_v16 }
 0x500   :  { %v316_v19 = vcombine.low %v218_v17, %v219_v18 }
 0x502   :  { %2794 = vst.sshfl [vmem:[#allocation2 + $0xc] sm:$0x33 pattern:$0x76325410] %v316_v19 }
 0x509   :  { %v791_v27 = vld [vmem:[#allocation2 + $0xc] sm:$0xf] }
 0x56e   :  { %v787_v21 = vpop.permute.xlu1 %786 }
 0x56f   :  { %v789_v22 = vmul.f32 %v787_v21, %v783_v20 }
 0x571   :  { %2813 = vmatmul.mubr.msk.f32.vlgmr.msra.gmra.mrb[2].mxu0 %vm569_vm1, %v789_v22 }
 0x572   :  { %2898 = vmatpush1.bf16.msra.mxu0 %v3361_v45  ;;  %1081 = vmatprep.mubr.f32.mxu0 %v3296_v1 }
 0x573   :  { %2900 = vmatprep.subr.bf16.mxu0 %v3363_v46 }
 0x576   :  { %2902 = vmatpush1.bf16.msra.mxu0 %v3368_v51 }
 0x577   :  { %2904 = vmatprep.subr.bf16.mxu0 %v3372_v52 }
 0x57a   :  { %2906 = vmatpush1.bf16.msra.mxu0 %v3376_v57 }
 0x57b   :  { %2908 = vmatprep.subr.bf16.mxu0 %v3380_v58 }
 0x57e   :  { %2910 = vmatpush1.bf16.msra.mxu0 %v3384_v61 }
 0x57f   :  { %2928 = vmatprep.subr.bf16.mxu0 %v3359_v41 }
 0x644   :  { %v861_v23 = vpop.f32.mrb[2].mxu0 }
 0x645   :  { %v863_v24 = vpop.f32.mrb[3].mxu0 }
 0x646   :  { %v868_v25 = vcombine.low %v861_v23, %v863_v24 }
 0x648   :  { %v875_v26 = vrot.slane %v868_v25, %v3344_v28 }
 0x64a   :  { %v877_v29 = vadd.f32 %v875_v26, %v791_v27 }
 0x64c   :  { %3173 = vtanh.f32 %v877_v29 }
 0x656   :  { %v3174_v32 = vpop.eup %3173 }
 0x657   :  { %v879_v33 = vmul.f32 %v3174_v32, %v3347_v30 }
 0x659   :  { %v880_v34 = vadd.f32 %v879_v33, %v3350_v31 }
 0x65b   :  { %892 = vrot.lane.b32.xlu0 %v880_v34, %s3295_s1  ;;  %v883_v35 = vrot.slane %v880_v34, 2  ;;  %v881_v38 = vmul.f32 %v880_v34, %v779_v7 }
 0x65d   :  { %v885_v37 = vmul.f32 %v883_v35, %v880_v34 }
 0x65f   :  { %72 = vperm.xlu0 %3160, %v34_v36   ;;  %887 = vrot.lane.b32.xlu1 %v885_v37, %s3295_s1 }
 0x6cd   :  { %v893_v42 = vpop.permute.xlu0 %892 }
 0x6ce   :  { %v894_v54 = vrot.slane %v893_v42, 2  ;;  %v36_v42 = vld [vmem:[%s3825_s0 + $0xc] sm:$0x3] }
 0x6d1   :  { %v888_v39 = vpop.permute.xlu1 %887 }
 0x6d2   :  { %v890_v40 = vadd.f32 %v888_v39, %v881_v38 }
 0x6d4   :  { %3175 = vtanh.f32 %v890_v40 }
 0x6de   :  { %v3176_v43 = vpop.eup %3175  ;;  %v73_v44 = vpop.permute.xlu0 %72 }
 0x6df   :  { %v169_v47 = vmul.f32 %v3331_v8, %v73_v44  ;;  %v170_v48 = vmul.f32 %v3333_v9, %v73_v44  ;;  %897 = vrot.lane.b32.xlu1 %v3176_v43, %s3295_s1 }
 0x6e1   :  { %v220_v49 = vadd.f32 %v3336_v10, %v169_v47  ;;  %v221_v50 = vadd.f32 %v3338_v11, %v170_v48 }
 0x6e3   :  { %v324_v53 = vcombine.low %v220_v49, %v221_v50 }
 0x6e5   :  { %2795 = vst.sshfl [vmem:[#allocation2 + $0x10] sm:$0x33 pattern:$0x76325410] %v324_v53 }
 0x6ec   :  { %v902_v0 = vld [vmem:[#allocation2 + $0x10] sm:$0xf] }
 0x751   :  { %v898_v55 = vpop.permute.xlu1 %897 }
 0x752   :  { %v900_v56 = vmul.f32 %v898_v55, %v894_v54 }
 0x754   :  { %2814 = vmatmul.mubr.msk.f32.vlgmr.msra.gmra.mrb[2].mxu1 %vm569_vm1, %v900_v56 }
 0x755   :  { %2914 = vmatpush1.bf16.msra.mxu1 %v3361_v45  ;;  %1192 = vmatprep.mubr.f32.mxu1 %v3296_v1 }
 0x756   :  { %2916 = vmatprep.subr.bf16.mxu1 %v3363_v46 }
 0x759   :  { %2918 = vmatpush1.bf16.msra.mxu1 %v3368_v51 }
 0x75a   :  { %2920 = vmatprep.subr.bf16.mxu1 %v3372_v52 }
 0x75d   :  { %2922 = vmatpush1.bf16.msra.mxu1 %v3376_v57 }
 0x75e   :  { %2924 = vmatprep.subr.bf16.mxu1 %v3380_v58 }
 0x761   :  { %2926 = vmatpush1.bf16.msra.mxu1 %v3384_v61 }
 0x762   :  { %2944 = vmatprep.subr.bf16.mxu1 %v3359_v41 }
 0x827   :  { %v972_v59 = vpop.f32.mrb[2].mxu1 }
 0x828   :  { %v974_v60 = vpop.f32.mrb[3].mxu1 }
 0x829   :  { %v979_v62 = vcombine.low %v972_v59, %v974_v60 }
 0x82b   :  { %v986_v63 = vrot.slane %v979_v62, %v3344_v28 }
 0x82d   :  { %v988_v2 = vadd.f32 %v986_v63, %v902_v0 }
 0x82f   :  { %3177 = vtanh.f32 %v988_v2 }
 0x839   :  { %v3178_v3 = vpop.eup %3177 }
 0x83a   :  { %v990_v5 = vmul.f32 %v3178_v3, %v3347_v30 }
 0x83c   :  { %v991_v6 = vadd.f32 %v990_v5, %v3350_v31 }
 0x83e   :  { %1003 = vrot.lane.b32.xlu0 %v991_v6, %s3295_s1  ;;  %v994_v7 = vrot.slane %v991_v6, 2  ;;  %v992_v14 = vmul.f32 %v991_v6, %v890_v40 }
 0x840   :  { %v996_v13 = vmul.f32 %v994_v7, %v991_v6 }
 0x842   :  { %77 = vperm.xlu0 %3160, %v35_v12   ;;  %998 = vrot.lane.b32.xlu1 %v996_v13, %s3295_s1 }
 0x8b0   :  { %v1004_v17 = vpop.permute.xlu0 %1003 }
 0x8b1   :  { %v1005_v25 = vrot.slane %v1004_v17, 2  ;;  %v37_v17 = vld [vmem:[%s3825_s0 + $0xe] sm:$0x3] }
 0x8b4   :  { %v999_v15 = vpop.permute.xlu1 %998 }
 0x8b5   :  { %v1001_v16 = vadd.f32 %v999_v15, %v992_v14 }
 0x8b7   :  { %3179 = vtanh.f32 %v1001_v16 }
 0x8c1   :  { %v3180_v18 = vpop.eup %3179  ;;  %v78_v19 = vpop.permute.xlu0 %77 }
 0x8c2   :  { %v171_v20 = vmul.f32 %v3331_v8, %v78_v19  ;;  %v172_v21 = vmul.f32 %v3333_v9, %v78_v19  ;;  %1008 = vrot.lane.b32.xlu1 %v3180_v18, %s3295_s1 }
 0x8c4   :  { %v222_v22 = vadd.f32 %v3336_v10, %v171_v20  ;;  %v223_v23 = vadd.f32 %v3338_v11, %v172_v21 }
 0x8c6   :  { %v332_v24 = vcombine.low %v222_v22, %v223_v23 }
 0x8c8   :  { %2796 = vst.sshfl [vmem:[#allocation2 + $0x14] sm:$0x33 pattern:$0x76325410] %v332_v24 }
 0x8cf   :  { %v1013_v35 = vld [vmem:[#allocation2 + $0x14] sm:$0xf] }
 0x934   :  { %v1009_v26 = vpop.permute.xlu1 %1008 }
 0x935   :  { %v1011_v27 = vmul.f32 %v1009_v26, %v1005_v25 }
 0x937   :  { %2815 = vmatmul.mubr.msk.f32.vlgmr.msra.gmra.mrb[4].mxu0 %vm569_vm1, %v1011_v27 }
 0x938   :  { %2930 = vmatpush1.bf16.msra.mxu0 %v3361_v45  ;;  %1303 = vmatprep.mubr.f32.mxu0 %v3296_v1 }
 0x939   :  { %2932 = vmatprep.subr.bf16.mxu0 %v3363_v46 }
 0x93c   :  { %2934 = vmatpush1.bf16.msra.mxu0 %v3368_v51 }
 0x93d   :  { %2936 = vmatprep.subr.bf16.mxu0 %v3372_v52 }
 0x940   :  { %2938 = vmatpush1.bf16.msra.mxu0 %v3376_v57 }
 0x941   :  { %2940 = vmatprep.subr.bf16.mxu0 %v3380_v58 }
 0x944   :  { %2942 = vmatpush1.bf16.msra.mxu0 %v3384_v61 }
 0x945   :  { %2960 = vmatprep.subr.bf16.mxu0 %v3359_v41 }
 0xa0a   :  { %v1083_v29 = vpop.f32.mrb[4].mxu0 }
 0xa0b   :  { %v1085_v32 = vpop.f32.mrb[5].mxu0 }
 0xa0c   :  { %v1090_v33 = vcombine.low %v1083_v29, %v1085_v32 }
 0xa0e   :  { %v1097_v34 = vrot.slane %v1090_v33, %v3344_v28 }
 0xa10   :  { %v1099_v36 = vadd.f32 %v1097_v34, %v1013_v35 }
 0xa12   :  { %3181 = vtanh.f32 %v1099_v36 }
 0xa1c   :  { %v3182_v37 = vpop.eup %3181 }
 0xa1d   :  { %v1101_v38 = vmul.f32 %v3182_v37, %v3347_v30 }
 0xa1f   :  { %v1102_v39 = vadd.f32 %v1101_v38, %v3350_v31 }
 0xa21   :  { %1114 = vrot.lane.b32.xlu0 %v1102_v39, %s3295_s1  ;;  %v1105_v40 = vrot.slane %v1102_v39, 2  ;;  %v1103_v44 = vmul.f32 %v1102_v39, %v1001_v16 }
 0xa23   :  { %v1107_v43 = vmul.f32 %v1105_v40, %v1102_v39 }
 0xa25   :  { %82 = vperm.xlu0 %3160, %v36_v42   ;;  %1109 = vrot.lane.b32.xlu1 %v1107_v43, %s3295_s1 }
 0xa93   :  { %v1115_v49 = vpop.permute.xlu0 %1114 }
 0xa94   :  { %v1116_v62 = vrot.slane %v1115_v49, 2  ;;  %v38_v49 = vld [vmem:[%s3825_s0 + $0x10] sm:$0x3] }
 0xa97   :  { %v1110_v47 = vpop.permute.xlu1 %1109 }
 0xa98   :  { %v1112_v48 = vadd.f32 %v1110_v47, %v1103_v44 }
 0xa9a   :  { %3183 = vtanh.f32 %v1112_v48 }
 0xaa4   :  { %v3184_v50 = vpop.eup %3183  ;;  %v83_v53 = vpop.permute.xlu0 %82 }
 0xaa5   :  { %v173_v54 = vmul.f32 %v3331_v8, %v83_v53  ;;  %v174_v55 = vmul.f32 %v3333_v9, %v83_v53  ;;  %1119 = vrot.lane.b32.xlu1 %v3184_v50, %s3295_s1 }
 0xaa7   :  { %v224_v56 = vadd.f32 %v3336_v10, %v173_v54  ;;  %v225_v59 = vadd.f32 %v3338_v11, %v174_v55 }
 0xaa9   :  { %v340_v60 = vcombine.low %v224_v56, %v225_v59 }
 0xaab   :  { %2797 = vst.sshfl [vmem:[#allocation2 + $0x18] sm:$0x33 pattern:$0x76325410] %v340_v60 }
 0xab2   :  { %v1124_v7 = vld [vmem:[#allocation2 + $0x18] sm:$0xf] }
 0xb17   :  { %v1120_v63 = vpop.permute.xlu1 %1119 }
 0xb18   :  { %v1122_v0 = vmul.f32 %v1120_v63, %v1116_v62 }
 0xb1a   :  { %2816 = vmatmul.mubr.msk.f32.vlgmr.msra.gmra.mrb[4].mxu1 %vm569_vm1, %v1122_v0 }
 0xb1b   :  { %2946 = vmatpush1.bf16.msra.mxu1 %v3361_v45  ;;  %1414 = vmatprep.mubr.f32.mxu1 %v3296_v1 }
 0xb1c   :  { %2948 = vmatprep.subr.bf16.mxu1 %v3363_v46 }
 0xb1f   :  { %2950 = vmatpush1.bf16.msra.mxu1 %v3368_v51 }
 0xb20   :  { %2952 = vmatprep.subr.bf16.mxu1 %v3372_v52 }
 0xb23   :  { %2954 = vmatpush1.bf16.msra.mxu1 %v3376_v57 }
 0xb24   :  { %2956 = vmatprep.subr.bf16.mxu1 %v3380_v58 }
 0xb27   :  { %2958 = vmatpush1.bf16.msra.mxu1 %v3384_v61 }
 0xb28   :  { %2976 = vmatprep.subr.bf16.mxu1 %v3359_v41 }
 0xbed   :  { %v1194_v2 = vpop.f32.mrb[4].mxu1 }
 0xbee   :  { %v1196_v3 = vpop.f32.mrb[5].mxu1 }
 0xbef   :  { %v1201_v5 = vcombine.low %v1194_v2, %v1196_v3 }
 0xbf1   :  { %v1208_v6 = vrot.slane %v1201_v5, %v3344_v28 }
 0xbf3   :  { %v1210_v12 = vadd.f32 %v1208_v6, %v1124_v7 }
 0xbf5   :  { %3185 = vtanh.f32 %v1210_v12 }
 0xbff   :  { %v3186_v13 = vpop.eup %3185 }
 0xc00   :  { %v1212_v14 = vmul.f32 %v3186_v13, %v3347_v30 }
 0xc02   :  { %v1213_v15 = vadd.f32 %v1212_v14, %v3350_v31 }
 0xc04   :  { %1225 = vrot.lane.b32.xlu0 %v1213_v15, %s3295_s1  ;;  %v1216_v16 = vrot.slane %v1213_v15, 2  ;;  %v1214_v19 = vmul.f32 %v1213_v15, %v1112_v48 }
 0xc06   :  { %v1218_v18 = vmul.f32 %v1216_v16, %v1213_v15 }
 0xc08   :  { %87 = vperm.xlu0 %3160, %v37_v17   ;;  %1220 = vrot.lane.b32.xlu1 %v1218_v18, %s3295_s1 }
 0xc76   :  { %v1226_v22 = vpop.permute.xlu0 %1225 }
 0xc77   :  { %v1227_v33 = vrot.slane %v1226_v22, 2  ;;  %v39_v22 = vld [vmem:[%s3825_s0 + $0x12] sm:$0x3] }
 0xc7a   :  { %v1221_v20 = vpop.permute.xlu1 %1220 }
 0xc7b   :  { %v1223_v21 = vadd.f32 %v1221_v20, %v1214_v19 }
 0xc7d   :  { %3187 = vtanh.f32 %v1223_v21 }
 0xc87   :  { %v3188_v23 = vpop.eup %3187  ;;  %v88_v24 = vpop.permute.xlu0 %87 }
 0xc88   :  { %v175_v25 = vmul.f32 %v3331_v8, %v88_v24  ;;  %v176_v26 = vmul.f32 %v3333_v9, %v88_v24  ;;  %1230 = vrot.lane.b32.xlu1 %v3188_v23, %s3295_s1 }
 0xc8a   :  { %v226_v27 = vadd.f32 %v3336_v10, %v175_v25  ;;  %v227_v29 = vadd.f32 %v3338_v11, %v176_v26 }
 0xc8c   :  { %v348_v32 = vcombine.low %v226_v27, %v227_v29 }
 0xc8e   :  { %2798 = vst.sshfl [vmem:[#allocation2 + $0x1c] sm:$0x33 pattern:$0x76325410] %v348_v32 }
 0xc95   :  { %v1235_v40 = vld [vmem:[#allocation2 + $0x1c] sm:$0xf] }
 0xcfa   :  { %v1231_v34 = vpop.permute.xlu1 %1230 }
 0xcfb   :  { %v1233_v35 = vmul.f32 %v1231_v34, %v1227_v33 }
 0xcfd   :  { %2817 = vmatmul.mubr.msk.f32.vlgmr.msra.gmra.mrb[6].mxu0 %vm569_vm1, %v1233_v35 }
 0xcfe   :  { %2962 = vmatpush1.bf16.msra.mxu0 %v3361_v45  ;;  %1525 = vmatprep.mubr.f32.mxu0 %v3296_v1 }
 0xcff   :  { %2964 = vmatprep.subr.bf16.mxu0 %v3363_v46 }
 0xd02   :  { %2966 = vmatpush1.bf16.msra.mxu0 %v3368_v51 }
 0xd03   :  { %2968 = vmatprep.subr.bf16.mxu0 %v3372_v52 }
 0xd06   :  { %2970 = vmatpush1.bf16.msra.mxu0 %v3376_v57 }
 0xd07   :  { %2972 = vmatprep.subr.bf16.mxu0 %v3380_v58 }
 0xd0a   :  { %2974 = vmatpush1.bf16.msra.mxu0 %v3384_v61 }
 0xd0b   :  { %2992 = vmatprep.subr.bf16.mxu0 %v3359_v41 }
 0xdd0   :  { %v1305_v36 = vpop.f32.mrb[6].mxu0 }
 0xdd1   :  { %v1307_v37 = vpop.f32.mrb[7].mxu0 }
 0xdd2   :  { %v1312_v38 = vcombine.low %v1305_v36, %v1307_v37 }
 0xdd4   :  { %v1319_v39 = vrot.slane %v1312_v38, %v3344_v28 }
 0xdd6   :  { %v1321_v42 = vadd.f32 %v1319_v39, %v1235_v40 }
 0xdd8   :  { %3189 = vtanh.f32 %v1321_v42 }
 0xde2   :  { %v3190_v43 = vpop.eup %3189 }
 0xde3   :  { %v1323_v44 = vmul.f32 %v3190_v43, %v3347_v30 }
 0xde5   :  { %v1324_v47 = vadd.f32 %v1323_v44, %v3350_v31 }
 0xde7   :  { %1336 = vrot.lane.b32.xlu0 %v1324_v47, %s3295_s1  ;;  %v1327_v48 = vrot.slane %v1324_v47, 2  ;;  %v1325_v53 = vmul.f32 %v1324_v47, %v1223_v21 }
 0xde9   :  { %v1329_v50 = vmul.f32 %v1327_v48, %v1324_v47 }
 0xdeb   :  { %92 = vperm.xlu0 %3160, %v38_v49   ;;  %1331 = vrot.lane.b32.xlu1 %v1329_v50, %s3295_s1 }
 0xe59   :  { %v1337_v56 = vpop.permute.xlu0 %1336 }
 0xe5a   :  { %v1338_v5 = vrot.slane %v1337_v56, 2  ;;  %v40_v56 = vld [vmem:[%s3825_s0 + $0x14] sm:$0x3] }
 0xe5d   :  { %v1332_v54 = vpop.permute.xlu1 %1331 }
 0xe5e   :  { %v1334_v55 = vadd.f32 %v1332_v54, %v1325_v53 }
 0xe60   :  { %3191 = vtanh.f32 %v1334_v55 }
 0xe6a   :  { %v3192_v59 = vpop.eup %3191  ;;  %v93_v60 = vpop.permute.xlu0 %92 }
 0xe6b   :  { %v177_v62 = vmul.f32 %v3331_v8, %v93_v60  ;;  %v178_v63 = vmul.f32 %v3333_v9, %v93_v60  ;;  %1341 = vrot.lane.b32.xlu1 %v3192_v59, %s3295_s1 }
 0xe6d   :  { %v228_v0 = vadd.f32 %v3336_v10, %v177_v62  ;;  %v229_v2 = vadd.f32 %v3338_v11, %v178_v63 }
 0xe6f   :  { %v356_v3 = vcombine.low %v228_v0, %v229_v2 }
 0xe71   :  { %2799 = vst.sshfl [vmem:[#allocation2 + $0x20] sm:$0x33 pattern:$0x76325410] %v356_v3 }
 0xe78   :  { %v1346_v16 = vld [vmem:[#allocation2 + $0x20] sm:$0xf] }
 0xedd   :  { %v1342_v6 = vpop.permute.xlu1 %1341 }
 0xede   :  { %v1344_v7 = vmul.f32 %v1342_v6, %v1338_v5 }
 0xee0   :  { %2818 = vmatmul.mubr.msk.f32.vlgmr.msra.gmra.mrb[6].mxu1 %vm569_vm1, %v1344_v7 }
 0xee1   :  { %2978 = vmatpush1.bf16.msra.mxu1 %v3361_v45  ;;  %1636 = vmatprep.mubr.f32.mxu1 %v3296_v1 }
 0xee2   :  { %2980 = vmatprep.subr.bf16.mxu1 %v3363_v46 }
 0xee5   :  { %2982 = vmatpush1.bf16.msra.mxu1 %v3368_v51 }
 0xee6   :  { %2984 = vmatprep.subr.bf16.mxu1 %v3372_v52 }
 0xee9   :  { %2986 = vmatpush1.bf16.msra.mxu1 %v3376_v57 }
 0xeea   :  { %2988 = vmatprep.subr.bf16.mxu1 %v3380_v58 }
 0xeed   :  { %2990 = vmatpush1.bf16.msra.mxu1 %v3384_v61 }
 0xeee   :  { %3008 = vmatprep.subr.bf16.mxu1 %v3359_v41 }
 0xfb3   :  { %v1416_v12 = vpop.f32.mrb[6].mxu1 }
 0xfb4   :  { %v1418_v13 = vpop.f32.mrb[7].mxu1 }
 0xfb5   :  { %v1423_v14 = vcombine.low %v1416_v12, %v1418_v13 }
 0xfb7   :  { %v1430_v15 = vrot.slane %v1423_v14, %v3344_v28 }
 0xfb9   :  { %v1432_v17 = vadd.f32 %v1430_v15, %v1346_v16 }
 0xfbb   :  { %3193 = vtanh.f32 %v1432_v17 }
 0xfc5   :  { %v3194_v18 = vpop.eup %3193 }
 0xfc6   :  { %v1434_v19 = vmul.f32 %v3194_v18, %v3347_v30 }
 0xfc8   :  { %v1435_v20 = vadd.f32 %v1434_v19, %v3350_v31 }
 0xfca   :  { %1447 = vrot.lane.b32.xlu0 %v1435_v20, %s3295_s1  ;;  %v1438_v21 = vrot.slane %v1435_v20, 2  ;;  %v1436_v24 = vmul.f32 %v1435_v20, %v1334_v55 }
 0xfcc   :  { %v1440_v23 = vmul.f32 %v1438_v21, %v1435_v20 }
 0xfce   :  { %97 = vperm.xlu0 %3160, %v39_v22   ;;  %1442 = vrot.lane.b32.xlu1 %v1440_v23, %s3295_s1 }
0x103c   :  { %v1448_v27 = vpop.permute.xlu0 %1447 }
0x103d   :  { %v1449_v38 = vrot.slane %v1448_v27, 2  ;;  %v41_v27 = vld [vmem:[%s3825_s0 + $0x16] sm:$0x3] }
0x1040   :  { %v1443_v25 = vpop.permute.xlu1 %1442 }
0x1041   :  { %v1445_v26 = vadd.f32 %v1443_v25, %v1436_v24 }
0x1043   :  { %3195 = vtanh.f32 %v1445_v26 }
0x104d   :  { %v3196_v29 = vpop.eup %3195  ;;  %v98_v32 = vpop.permute.xlu0 %97 }
0x104e   :  { %v179_v33 = vmul.f32 %v3331_v8, %v98_v32  ;;  %v180_v34 = vmul.f32 %v3333_v9, %v98_v32  ;;  %1452 = vrot.lane.b32.xlu1 %v3196_v29, %s3295_s1 }
0x1050   :  { %v230_v35 = vadd.f32 %v3336_v10, %v179_v33  ;;  %v231_v36 = vadd.f32 %v3338_v11, %v180_v34 }
0x1052   :  { %v364_v37 = vcombine.low %v230_v35, %v231_v36 }
0x1054   :  { %2800 = vst.sshfl [vmem:[#allocation2 + $0x24] sm:$0x33 pattern:$0x76325410] %v364_v37 }
0x105b   :  { %v1457_v48 = vld [vmem:[#allocation2 + $0x24] sm:$0xf] }
0x10c0   :  { %v1453_v39 = vpop.permute.xlu1 %1452 }
0x10c1   :  { %v1455_v40 = vmul.f32 %v1453_v39, %v1449_v38 }
0x10c3   :  { %2819 = vmatmul.mubr.msk.f32.vlgmr.msra.gmra.mrb[8].mxu0 %vm569_vm1, %v1455_v40 }
0x10c4   :  { %2994 = vmatpush1.bf16.msra.mxu0 %v3361_v45  ;;  %1747 = vmatprep.mubr.f32.mxu0 %v3296_v1 }
0x10c5   :  { %2996 = vmatprep.subr.bf16.mxu0 %v3363_v46 }
0x10c8   :  { %2998 = vmatpush1.bf16.msra.mxu0 %v3368_v51 }
0x10c9   :  { %3000 = vmatprep.subr.bf16.mxu0 %v3372_v52 }
0x10cc   :  { %3002 = vmatpush1.bf16.msra.mxu0 %v3376_v57 }
0x10cd   :  { %3004 = vmatprep.subr.bf16.mxu0 %v3380_v58 }
0x10d0   :  { %3006 = vmatpush1.bf16.msra.mxu0 %v3384_v61 }
0x10d1   :  { %3024 = vmatprep.subr.bf16.mxu0 %v3359_v41 }
0x1196   :  { %v1527_v42 = vpop.f32.mrb[8].mxu0 }
0x1197   :  { %v1529_v43 = vpop.f32.mrb[9].mxu0 }
0x1198   :  { %v1534_v44 = vcombine.low %v1527_v42, %v1529_v43 }
0x119a   :  { %v1541_v47 = vrot.slane %v1534_v44, %v3344_v28 }
0x119c   :  { %v1543_v49 = vadd.f32 %v1541_v47, %v1457_v48 }
0x119e   :  { %3197 = vtanh.f32 %v1543_v49 }
0x11a8   :  { %v3198_v50 = vpop.eup %3197 }
0x11a9   :  { %v1545_v53 = vmul.f32 %v3198_v50, %v3347_v30 }
0x11ab   :  { %v1546_v54 = vadd.f32 %v1545_v53, %v3350_v31 }
0x11ad   :  { %1558 = vrot.lane.b32.xlu0 %v1546_v54, %s3295_s1  ;;  %v1549_v55 = vrot.slane %v1546_v54, 2  ;;  %v1547_v60 = vmul.f32 %v1546_v54, %v1445_v26 }
0x11af   :  { %v1551_v59 = vmul.f32 %v1549_v55, %v1546_v54 }
0x11b1   :  { %102 = vperm.xlu0 %3160, %v40_v56   ;;  %1553 = vrot.lane.b32.xlu1 %v1551_v59, %s3295_s1 }
0x121f   :  { %v1559_v0 = vpop.permute.xlu0 %1558 }
0x1220   :  { %v1560_v14 = vrot.slane %v1559_v0, 2  ;;  %v42_v0 = vld [vmem:[%s3825_s0 + $0x18] sm:$0x3] }
0x1223   :  { %v1554_v62 = vpop.permute.xlu1 %1553 }
0x1224   :  { %v1556_v63 = vadd.f32 %v1554_v62, %v1547_v60 }
0x1226   :  { %3199 = vtanh.f32 %v1556_v63 }
0x1230   :  { %v3200_v2 = vpop.eup %3199  ;;  %v103_v3 = vpop.permute.xlu0 %102 }
0x1231   :  { %v181_v5 = vmul.f32 %v3331_v8, %v103_v3  ;;  %v182_v6 = vmul.f32 %v3333_v9, %v103_v3  ;;  %1563 = vrot.lane.b32.xlu1 %v3200_v2, %s3295_s1 }
0x1233   :  { %v232_v7 = vadd.f32 %v3336_v10, %v181_v5  ;;  %v233_v12 = vadd.f32 %v3338_v11, %v182_v6 }
0x1235   :  { %v372_v13 = vcombine.low %v232_v7, %v233_v12 }
0x1237   :  { %2801 = vst.sshfl [vmem:[#allocation2 + $0x28] sm:$0x33 pattern:$0x76325410] %v372_v13 }
0x123e   :  { %v1568_v21 = vld [vmem:[#allocation2 + $0x28] sm:$0xf] }
0x12a3   :  { %v1564_v15 = vpop.permute.xlu1 %1563 }
0x12a4   :  { %v1566_v16 = vmul.f32 %v1564_v15, %v1560_v14 }
0x12a6   :  { %2820 = vmatmul.mubr.msk.f32.vlgmr.msra.gmra.mrb[8].mxu1 %vm569_vm1, %v1566_v16 }
0x12a7   :  { %3010 = vmatpush1.bf16.msra.mxu1 %v3361_v45  ;;  %1858 = vmatprep.mubr.f32.mxu1 %v3296_v1 }
0x12a8   :  { %3012 = vmatprep.subr.bf16.mxu1 %v3363_v46 }
0x12ab   :  { %3014 = vmatpush1.bf16.msra.mxu1 %v3368_v51 }
0x12ac   :  { %3016 = vmatprep.subr.bf16.mxu1 %v3372_v52 }
0x12af   :  { %3018 = vmatpush1.bf16.msra.mxu1 %v3376_v57 }
0x12b0   :  { %3020 = vmatprep.subr.bf16.mxu1 %v3380_v58 }
0x12b3   :  { %3022 = vmatpush1.bf16.msra.mxu1 %v3384_v61 }
0x12b4   :  { %3040 = vmatprep.subr.bf16.mxu1 %v3359_v41 }
0x1379   :  { %v1638_v17 = vpop.f32.mrb[8].mxu1 }
0x137a   :  { %v1640_v18 = vpop.f32.mrb[9].mxu1 }
0x137b   :  { %v1645_v19 = vcombine.low %v1638_v17, %v1640_v18 }
0x137d   :  { %v1652_v20 = vrot.slane %v1645_v19, %v3344_v28 }
0x137f   :  { %v1654_v22 = vadd.f32 %v1652_v20, %v1568_v21 }
0x1381   :  { %3201 = vtanh.f32 %v1654_v22 }
0x138b   :  { %v3202_v23 = vpop.eup %3201 }
0x138c   :  { %v1656_v24 = vmul.f32 %v3202_v23, %v3347_v30 }
0x138e   :  { %v1657_v25 = vadd.f32 %v1656_v24, %v3350_v31 }
0x1390   :  { %1669 = vrot.lane.b32.xlu0 %v1657_v25, %s3295_s1  ;;  %v1660_v26 = vrot.slane %v1657_v25, 2  ;;  %v1658_v32 = vmul.f32 %v1657_v25, %v1556_v63 }
0x1392   :  { %v1662_v29 = vmul.f32 %v1660_v26, %v1657_v25 }
0x1394   :  { %107 = vperm.xlu0 %3160, %v41_v27   ;;  %1664 = vrot.lane.b32.xlu1 %v1662_v29, %s3295_s1 }
0x1402   :  { %v1670_v35 = vpop.permute.xlu0 %1669 }
0x1403   :  { %v1671_v44 = vrot.slane %v1670_v35, 2  ;;  %v43_v35 = vld [vmem:[%s3825_s0 + $0x1a] sm:$0x3] }
0x1406   :  { %v1665_v33 = vpop.permute.xlu1 %1664 }
0x1407   :  { %v1667_v34 = vadd.f32 %v1665_v33, %v1658_v32 }
0x1409   :  { %3203 = vtanh.f32 %v1667_v34 }
0x1413   :  { %v3204_v36 = vpop.eup %3203  ;;  %v108_v37 = vpop.permute.xlu0 %107 }
0x1414   :  { %v183_v38 = vmul.f32 %v3331_v8, %v108_v37  ;;  %v184_v39 = vmul.f32 %v3333_v9, %v108_v37  ;;  %1674 = vrot.lane.b32.xlu1 %v3204_v36, %s3295_s1 }
0x1416   :  { %v234_v40 = vadd.f32 %v3336_v10, %v183_v38  ;;  %v235_v42 = vadd.f32 %v3338_v11, %v184_v39 }
0x1418   :  { %v380_v43 = vcombine.low %v234_v40, %v235_v42 }
0x141a   :  { %2802 = vst.sshfl [vmem:[#allocation2 + $0x2c] sm:$0x33 pattern:$0x76325410] %v380_v43 }
0x1421   :  { %v1679_v55 = vld [vmem:[#allocation2 + $0x2c] sm:$0xf] }
0x1486   :  { %v1675_v47 = vpop.permute.xlu1 %1674 }
0x1487   :  { %v1677_v48 = vmul.f32 %v1675_v47, %v1671_v44 }
0x1489   :  { %2821 = vmatmul.mubr.msk.f32.vlgmr.msra.gmra.mrb[10].mxu0 %vm569_vm1, %v1677_v48 }
0x148a   :  { %3026 = vmatpush1.bf16.msra.mxu0 %v3361_v45  ;;  %1969 = vmatprep.mubr.f32.mxu0 %v3296_v1 }
0x148b   :  { %3028 = vmatprep.subr.bf16.mxu0 %v3363_v46 }
0x148e   :  { %3030 = vmatpush1.bf16.msra.mxu0 %v3368_v51 }
0x148f   :  { %3032 = vmatprep.subr.bf16.mxu0 %v3372_v52 }
0x1492   :  { %3034 = vmatpush1.bf16.msra.mxu0 %v3376_v57 }
0x1493   :  { %3036 = vmatprep.subr.bf16.mxu0 %v3380_v58 }
0x1496   :  { %3038 = vmatpush1.bf16.msra.mxu0 %v3384_v61 }
0x1497   :  { %3056 = vmatprep.subr.bf16.mxu0 %v3359_v41 }
0x155c   :  { %v1749_v49 = vpop.f32.mrb[10].mxu0 }
0x155d   :  { %v1751_v50 = vpop.f32.mrb[11].mxu0 }
0x155e   :  { %v1756_v53 = vcombine.low %v1749_v49, %v1751_v50 }
0x1560   :  { %v1763_v54 = vrot.slane %v1756_v53, %v3344_v28 }
0x1562   :  { %v1765_v56 = vadd.f32 %v1763_v54, %v1679_v55 }
0x1564   :  { %3205 = vtanh.f32 %v1765_v56 }
0x156e   :  { %v3206_v59 = vpop.eup %3205 }
0x156f   :  { %v1767_v60 = vmul.f32 %v3206_v59, %v3347_v30 }
0x1571   :  { %v1768_v62 = vadd.f32 %v1767_v60, %v3350_v31 }
0x1573   :  { %1780 = vrot.lane.b32.xlu0 %v1768_v62, %s3295_s1  ;;  %v1771_v63 = vrot.slane %v1768_v62, 2  ;;  %v1769_v3 = vmul.f32 %v1768_v62, %v1667_v34 }
0x1575   :  { %v1773_v2 = vmul.f32 %v1771_v63, %v1768_v62 }
0x1577   :  { %112 = vperm.xlu0 %3160, %v42_v0   ;;  %1775 = vrot.lane.b32.xlu1 %v1773_v2, %s3295_s1 }
0x15e5   :  { %v1781_v7 = vpop.permute.xlu0 %1780 }
0x15e6   :  { %v1782_v19 = vrot.slane %v1781_v7, 2  ;;  %v44_v7 = vld [vmem:[%s3825_s0 + $0x1c] sm:$0x3] }
0x15e9   :  { %v1776_v5 = vpop.permute.xlu1 %1775 }
0x15ea   :  { %v1778_v6 = vadd.f32 %v1776_v5, %v1769_v3 }
0x15ec   :  { %3207 = vtanh.f32 %v1778_v6 }
0x15f6   :  { %v3208_v12 = vpop.eup %3207  ;;  %v113_v13 = vpop.permute.xlu0 %112 }
0x15f7   :  { %v185_v14 = vmul.f32 %v3331_v8, %v113_v13  ;;  %v186_v15 = vmul.f32 %v3333_v9, %v113_v13  ;;  %1785 = vrot.lane.b32.xlu1 %v3208_v12, %s3295_s1 }
0x15f9   :  { %v236_v16 = vadd.f32 %v3336_v10, %v185_v14  ;;  %v237_v17 = vadd.f32 %v3338_v11, %v186_v15 }
0x15fb   :  { %v388_v18 = vcombine.low %v236_v16, %v237_v17 }
0x15fd   :  { %2803 = vst.sshfl [vmem:[#allocation2 + $0x30] sm:$0x33 pattern:$0x76325410] %v388_v18 }
0x1604   :  { %v1790_v26 = vld [vmem:[#allocation2 + $0x30] sm:$0xf] }
0x1669   :  { %v1786_v20 = vpop.permute.xlu1 %1785 }
0x166a   :  { %v1788_v21 = vmul.f32 %v1786_v20, %v1782_v19 }
0x166c   :  { %2822 = vmatmul.mubr.msk.f32.vlgmr.msra.gmra.mrb[10].mxu1 %vm569_vm1, %v1788_v21 }
0x166d   :  { %3042 = vmatpush1.bf16.msra.mxu1 %v3361_v45  ;;  %2080 = vmatprep.mubr.f32.mxu1 %v3296_v1 }
0x166e   :  { %3044 = vmatprep.subr.bf16.mxu1 %v3363_v46 }
0x1671   :  { %3046 = vmatpush1.bf16.msra.mxu1 %v3368_v51 }
0x1672   :  { %3048 = vmatprep.subr.bf16.mxu1 %v3372_v52 }
0x1675   :  { %3050 = vmatpush1.bf16.msra.mxu1 %v3376_v57 }
0x1676   :  { %3052 = vmatprep.subr.bf16.mxu1 %v3380_v58 }
0x1679   :  { %3054 = vmatpush1.bf16.msra.mxu1 %v3384_v61 }
0x167a   :  { %3072 = vmatprep.subr.bf16.mxu1 %v3359_v41 }
0x173f   :  { %v1860_v22 = vpop.f32.mrb[10].mxu1 }
0x1740   :  { %v1862_v23 = vpop.f32.mrb[11].mxu1 }
0x1741   :  { %v1867_v24 = vcombine.low %v1860_v22, %v1862_v23 }
0x1743   :  { %v1874_v25 = vrot.slane %v1867_v24, %v3344_v28 }
0x1745   :  { %v1876_v27 = vadd.f32 %v1874_v25, %v1790_v26 }
0x1747   :  { %3209 = vtanh.f32 %v1876_v27 }
0x1751   :  { %v3210_v29 = vpop.eup %3209 }
0x1752   :  { %v1878_v32 = vmul.f32 %v3210_v29, %v3347_v30 }
0x1754   :  { %v1879_v33 = vadd.f32 %v1878_v32, %v3350_v31 }
0x1756   :  { %1891 = vrot.lane.b32.xlu0 %v1879_v33, %s3295_s1  ;;  %v1882_v34 = vrot.slane %v1879_v33, 2  ;;  %v1880_v37 = vmul.f32 %v1879_v33, %v1778_v6 }
0x1758   :  { %v1884_v36 = vmul.f32 %v1882_v34, %v1879_v33 }
0x175a   :  { %117 = vperm.xlu0 %3160, %v43_v35   ;;  %1886 = vrot.lane.b32.xlu1 %v1884_v36, %s3295_s1 }
0x17c8   :  { %v1892_v40 = vpop.permute.xlu0 %1891 }
0x17c9   :  { %v1893_v53 = vrot.slane %v1892_v40, 2  ;;  %v45_v40 = vld [vmem:[%s3825_s0 + $0x1e] sm:$0x3] }
0x17cc   :  { %v1887_v38 = vpop.permute.xlu1 %1886 }
0x17cd   :  { %v1889_v39 = vadd.f32 %v1887_v38, %v1880_v37 }
0x17cf   :  { %3211 = vtanh.f32 %v1889_v39 }
0x17d9   :  { %v3212_v42 = vpop.eup %3211  ;;  %v118_v43 = vpop.permute.xlu0 %117 }
0x17da   :  { %v187_v44 = vmul.f32 %v3331_v8, %v118_v43  ;;  %v188_v47 = vmul.f32 %v3333_v9, %v118_v43  ;;  %1896 = vrot.lane.b32.xlu1 %v3212_v42, %s3295_s1 }
0x17dc   :  { %v238_v48 = vadd.f32 %v3336_v10, %v187_v44  ;;  %v239_v49 = vadd.f32 %v3338_v11, %v188_v47 }
0x17de   :  { %v396_v50 = vcombine.low %v238_v48, %v239_v49 }
0x17e0   :  { %2804 = vst.sshfl [vmem:[#allocation2 + $0x34] sm:$0x33 pattern:$0x76325410] %v396_v50 }
0x17e7   :  { %v1901_v63 = vld [vmem:[#allocation2 + $0x34] sm:$0xf] }
0x184c   :  { %v1897_v54 = vpop.permute.xlu1 %1896 }
0x184d   :  { %v1899_v55 = vmul.f32 %v1897_v54, %v1893_v53 }
0x184f   :  { %2823 = vmatmul.mubr.msk.f32.vlgmr.msra.gmra.mrb[12].mxu0 %vm569_vm1, %v1899_v55 }
0x1850   :  { %3058 = vmatpush1.bf16.msra.mxu0 %v3361_v45  ;;  %2191 = vmatprep.mubr.f32.mxu0 %v3296_v1 }
0x1851   :  { %3060 = vmatprep.subr.bf16.mxu0 %v3363_v46 }
0x1854   :  { %3062 = vmatpush1.bf16.msra.mxu0 %v3368_v51 }
0x1855   :  { %3064 = vmatprep.subr.bf16.mxu0 %v3372_v52 }
0x1858   :  { %3066 = vmatpush1.bf16.msra.mxu0 %v3376_v57 }
0x1859   :  { %3068 = vmatprep.subr.bf16.mxu0 %v3380_v58 }
0x185c   :  { %3070 = vmatpush1.bf16.msra.mxu0 %v3384_v61 }
0x185d   :  { %3088 = vmatprep.subr.bf16.mxu0 %v3359_v41 }
0x1922   :  { %v1971_v56 = vpop.f32.mrb[12].mxu0 }
0x1923   :  { %v1973_v59 = vpop.f32.mrb[13].mxu0 }
0x1924   :  { %v1978_v60 = vcombine.low %v1971_v56, %v1973_v59 }
0x1926   :  { %v1985_v62 = vrot.slane %v1978_v60, %v3344_v28 }
0x1928   :  { %v1987_v0 = vadd.f32 %v1985_v62, %v1901_v63 }
0x192a   :  { %3213 = vtanh.f32 %v1987_v0 }
0x1934   :  { %v3214_v2 = vpop.eup %3213 }
0x1935   :  { %v1989_v3 = vmul.f32 %v3214_v2, %v3347_v30 }
0x1937   :  { %v1990_v5 = vadd.f32 %v1989_v3, %v3350_v31 }
0x1939   :  { %2002 = vrot.lane.b32.xlu0 %v1990_v5, %s3295_s1  ;;  %v1993_v6 = vrot.slane %v1990_v5, 2  ;;  %v1991_v13 = vmul.f32 %v1990_v5, %v1889_v39 }
0x193b   :  { %v1995_v12 = vmul.f32 %v1993_v6, %v1990_v5 }
0x193d   :  { %122 = vperm.xlu0 %3160, %v44_v7   ;;  %1997 = vrot.lane.b32.xlu1 %v1995_v12, %s3295_s1 }
0x19ab   :  { %v2003_v16 = vpop.permute.xlu0 %2002 }
0x19ac   :  { %v2004_v24 = vrot.slane %v2003_v16, 2 }
0x19af   :  { %v1998_v14 = vpop.permute.xlu1 %1997 }
0x19b0   :  { %v2000_v15 = vadd.f32 %v1998_v14, %v1991_v13 }
0x19b2   :  { %3215 = vtanh.f32 %v2000_v15 }
0x19bc   :  { %v3216_v17 = vpop.eup %3215  ;;  %v123_v18 = vpop.permute.xlu0 %122 }
0x19bd   :  { %v189_v19 = vmul.f32 %v3331_v8, %v123_v18  ;;  %v190_v20 = vmul.f32 %v3333_v9, %v123_v18  ;;  %2007 = vrot.lane.b32.xlu1 %v3216_v17, %s3295_s1 }
0x19bf   :  { %v240_v21 = vadd.f32 %v3336_v10, %v189_v19  ;;  %v241_v22 = vadd.f32 %v3338_v11, %v190_v20 }
0x19c1   :  { %v404_v23 = vcombine.low %v240_v21, %v241_v22 }
0x19c3   :  { %2805 = vst.sshfl [vmem:[#allocation2 + $0x38] sm:$0x33 pattern:$0x76325410] %v404_v23 }
0x19ca   :  { %v2012_v34 = vld [vmem:[#allocation2 + $0x38] sm:$0xf] }
0x1a2f   :  { %v2008_v25 = vpop.permute.xlu1 %2007 }
0x1a30   :  { %v2010_v26 = vmul.f32 %v2008_v25, %v2004_v24 }
0x1a32   :  { %2824 = vmatmul.mubr.msk.f32.vlgmr.msra.gmra.mrb[12].mxu1 %vm569_vm1, %v2010_v26 }
0x1a33   :  { %3074 = vmatpush1.bf16.msra.mxu1 %v3361_v45  ;;  %2302 = vmatprep.mubr.f32.mxu1 %v3296_v1 }
0x1a34   :  { %3076 = vmatprep.subr.bf16.mxu1 %v3363_v46 }
0x1a37   :  { %3078 = vmatpush1.bf16.msra.mxu1 %v3368_v51 }
0x1a38   :  { %3080 = vmatprep.subr.bf16.mxu1 %v3372_v52 }
0x1a3b   :  { %3082 = vmatpush1.bf16.msra.mxu1 %v3376_v57 }
0x1a3c   :  { %3084 = vmatprep.subr.bf16.mxu1 %v3380_v58 }
0x1a3f   :  { %3086 = vmatpush1.bf16.msra.mxu1 %v3384_v61 }
0x1a40   :  { %3104 = vmatprep.subr.bf16.mxu1 %v3359_v41 }
0x1b05   :  { %v2082_v27 = vpop.f32.mrb[12].mxu1 }
0x1b06   :  { %v2084_v29 = vpop.f32.mrb[13].mxu1 }
0x1b07   :  { %v2089_v32 = vcombine.low %v2082_v27, %v2084_v29 }
0x1b09   :  { %v2096_v33 = vrot.slane %v2089_v32, %v3344_v28 }
0x1b0b   :  { %v2098_v35 = vadd.f32 %v2096_v33, %v2012_v34 }
0x1b0d   :  { %3217 = vtanh.f32 %v2098_v35 }
0x1b17   :  { %v3218_v36 = vpop.eup %3217 }
0x1b18   :  { %v2100_v37 = vmul.f32 %v3218_v36, %v3347_v30 }
0x1b1a   :  { %v2101_v38 = vadd.f32 %v2100_v37, %v3350_v31 }
0x1b1c   :  { %2113 = vrot.lane.b32.xlu0 %v2101_v38, %s3295_s1  ;;  %v2104_v39 = vrot.slane %v2101_v38, 2  ;;  %v2102_v43 = vmul.f32 %v2101_v38, %v2000_v15 }
0x1b1e   :  { %v2106_v42 = vmul.f32 %v2104_v39, %v2101_v38 }
0x1b20   :  { %127 = vperm.xlu0 %3160, %v45_v40   ;;  %2108 = vrot.lane.b32.xlu1 %v2106_v42, %s3295_s1 }
0x1b8e   :  { %v2114_v48 = vpop.permute.xlu0 %2113 }
0x1b8f   :  { %v2115_v60 = vrot.slane %v2114_v48, 2 }
0x1b92   :  { %v2109_v44 = vpop.permute.xlu1 %2108 }
0x1b93   :  { %v2111_v47 = vadd.f32 %v2109_v44, %v2102_v43 }
0x1b95   :  { %3219 = vtanh.f32 %v2111_v47 }
0x1b9f   :  { %v3220_v49 = vpop.eup %3219  ;;  %v128_v50 = vpop.permute.xlu0 %127 }
0x1ba0   :  { %v191_v53 = vmul.f32 %v3331_v8, %v128_v50  ;;  %v192_v54 = vmul.f32 %v3333_v9, %v128_v50  ;;  %2118 = vrot.lane.b32.xlu1 %v3220_v49, %s3295_s1 }
0x1ba2   :  { %v242_v55 = vadd.f32 %v3336_v10, %v191_v53  ;;  %v243_v56 = vadd.f32 %v3338_v11, %v192_v54 }
0x1ba4   :  { %v412_v59 = vcombine.low %v242_v55, %v243_v56 }
0x1ba6   :  { %2806 = vst.sshfl [vmem:[#allocation2 + $0x3c] sm:$0x33 pattern:$0x76325410] %v412_v59 }
0x1bad   :  { %v2123_v6 = vld [vmem:[#allocation2 + $0x3c] sm:$0xf] }
0x1c12   :  { %v2119_v62 = vpop.permute.xlu1 %2118 }
0x1c13   :  { %v2121_v63 = vmul.f32 %v2119_v62, %v2115_v60 }
0x1c15   :  { %2825 = vmatmul.mubr.msk.f32.vlgmr.msra.gmra.mrb[14].mxu0 %vm569_vm1, %v2121_v63 }
0x1c16   :  { %3090 = vmatpush1.bf16.msra.mxu0 %v3361_v45  ;;  %2413 = vmatprep.mubr.f32.mxu0 %v3296_v1 }
0x1c17   :  { %3092 = vmatprep.subr.bf16.mxu0 %v3363_v46 }
0x1c1a   :  { %3094 = vmatpush1.bf16.msra.mxu0 %v3368_v51 }
0x1c1b   :  { %3096 = vmatprep.subr.bf16.mxu0 %v3372_v52 }
0x1c1e   :  { %3098 = vmatpush1.bf16.msra.mxu0 %v3376_v57 }
0x1c1f   :  { %3100 = vmatprep.subr.bf16.mxu0 %v3380_v58 }
0x1c22   :  { %3102 = vmatpush1.bf16.msra.mxu0 %v3384_v61 }
0x1c23   :  { %3120 = vmatprep.subr.bf16.mxu0 %v3359_v41  ;;  %v46_v41 = vld [vmem:[%s3825_s0 + $0x20] sm:$0x3] }
0x1ce8   :  { %v2193_v0 = vpop.f32.mrb[14].mxu0 }
0x1ce9   :  { %v2195_v2 = vpop.f32.mrb[15].mxu0 }
0x1cea   :  { %v2200_v3 = vcombine.low %v2193_v0, %v2195_v2 }
0x1cec   :  { %v2207_v5 = vrot.slane %v2200_v3, %v3344_v28 }
0x1cee   :  { %v2209_v7 = vadd.f32 %v2207_v5, %v2123_v6 }
0x1cf0   :  { %3221 = vtanh.f32 %v2209_v7 }
0x1cfa   :  { %v3222_v12 = vpop.eup %3221 }
0x1cfb   :  { %v2211_v13 = vmul.f32 %v3222_v12, %v3347_v30 }
0x1cfd   :  { %v2212_v14 = vadd.f32 %v2211_v13, %v3350_v31 }
0x1cff   :  { %2224 = vrot.lane.b32.xlu0 %v2212_v14, %s3295_s1  ;;  %v2215_v15 = vrot.slane %v2212_v14, 2  ;;  %v2213_v17 = vmul.f32 %v2212_v14, %v2111_v47  ;;  %v47_v47 = vld [vmem:[%s3825_s0 + $0x22] sm:$0x3] }
0x1d01   :  { %v2217_v16 = vmul.f32 %v2215_v15, %v2212_v14 }
0x1d03   :  { %132 = vperm.xlu0 %3160, %v46_v41   ;;  %2219 = vrot.lane.b32.xlu1 %v2217_v16, %s3295_s1 }
0x1d71   :  { %v2225_v20 = vpop.permute.xlu0 %2224 }
0x1d72   :  { %v2226_v29 = vrot.slane %v2225_v20, 2 }
0x1d75   :  { %v2220_v18 = vpop.permute.xlu1 %2219 }
0x1d76   :  { %v2222_v19 = vadd.f32 %v2220_v18, %v2213_v17 }
0x1d78   :  { %3223 = vtanh.f32 %v2222_v19 }
0x1d82   :  { %v3224_v21 = vpop.eup %3223  ;;  %v133_v22 = vpop.permute.xlu0 %132 }
0x1d83   :  { %v193_v23 = vmul.f32 %v3331_v8, %v133_v22  ;;  %v194_v24 = vmul.f32 %v3333_v9, %v133_v22  ;;  %2229 = vrot.lane.b32.xlu1 %v3224_v21, %s3295_s1 }
0x1d85   :  { %v244_v25 = vadd.f32 %v3336_v10, %v193_v23  ;;  %v245_v26 = vadd.f32 %v3338_v11, %v194_v24 }
0x1d87   :  { %v420_v27 = vcombine.low %v244_v25, %v245_v26 }
0x1d89   :  { %2807 = vst.sshfl [vmem:[#allocation2 + $0x40] sm:$0x33 pattern:$0x76325410] %v420_v27 }
0x1d90   :  { %v2234_v38 = vld [vmem:[#allocation2 + $0x40] sm:$0xf] }
0x1df5   :  { %v2230_v32 = vpop.permute.xlu1 %2229 }
0x1df6   :  { %v2232_v33 = vmul.f32 %v2230_v32, %v2226_v29 }
0x1df8   :  { %2826 = vmatmul.mubr.msk.f32.vlgmr.msra.gmra.mrb[14].mxu1 %vm569_vm1, %v2232_v33 }
0x1df9   :  { %3106 = vmatpush1.bf16.msra.mxu1 %v3361_v45  ;;  %2524 = vmatprep.mubr.f32.mxu1 %v3296_v1 }
0x1dfa   :  { %3108 = vmatprep.subr.bf16.mxu1 %v3363_v46 }
0x1dfd   :  { %3110 = vmatpush1.bf16.msra.mxu1 %v3368_v51 }
0x1dfe   :  { %3112 = vmatprep.subr.bf16.mxu1 %v3372_v52 }
0x1e01   :  { %3114 = vmatpush1.bf16.msra.mxu1 %v3376_v57 }
0x1e02   :  { %3116 = vmatprep.subr.bf16.mxu1 %v3380_v58 }
0x1e05   :  { %3118 = vmatpush1.bf16.msra.mxu1 %v3384_v61 }
0x1ecb   :  { %v2304_v34 = vpop.f32.mrb[14].mxu1 }
0x1ecc   :  { %v2306_v35 = vpop.f32.mrb[15].mxu1 }
0x1ecd   :  { %v2311_v36 = vcombine.low %v2304_v34, %v2306_v35 }
0x1ecf   :  { %v2318_v37 = vrot.slane %v2311_v36, %v3344_v28 }
0x1ed1   :  { %v2320_v39 = vadd.f32 %v2318_v37, %v2234_v38 }
0x1ed3   :  { %3225 = vtanh.f32 %v2320_v39 }
0x1edd   :  { %v3226_v40 = vpop.eup %3225 }
0x1ede   :  { %v2322_v42 = vmul.f32 %v3226_v40, %v3347_v30 }
0x1ee0   :  { %v2323_v43 = vadd.f32 %v2322_v42, %v3350_v31 }
0x1ee2   :  { %2335 = vrot.lane.b32.xlu0 %v2323_v43, %s3295_s1  ;;  %v2326_v44 = vrot.slane %v2323_v43, 2  ;;  %v2324_v49 = vmul.f32 %v2323_v43, %v2222_v19 }
0x1ee4   :  { %v2328_v48 = vmul.f32 %v2326_v44, %v2323_v43 }
0x1ee6   :  { %137 = vperm.xlu0 %3160, %v47_v47   ;;  %2330 = vrot.lane.b32.xlu1 %v2328_v48, %s3295_s1 }
0x1f54   :  { %v2336_v54 = vpop.permute.xlu0 %2335 }
0x1f55   :  { %v2337_v2 = vrot.slane %v2336_v54, 2 }
0x1f58   :  { %v2331_v50 = vpop.permute.xlu1 %2330 }
0x1f59   :  { %v2333_v53 = vadd.f32 %v2331_v50, %v2324_v49 }
0x1f5b   :  { %3227 = vtanh.f32 %v2333_v53 }
0x1f65   :  { %v3228_v55 = vpop.eup %3227  ;;  %v138_v56 = vpop.permute.xlu0 %137 }
0x1f66   :  { %v195_v59 = vmul.f32 %v3331_v8, %v138_v56  ;;  %v196_v60 = vmul.f32 %v3333_v9, %v138_v56  ;;  %2340 = vrot.lane.b32.xlu1 %v3228_v55, %s3295_s1 }
0x1f68   :  { %v246_v62 = vadd.f32 %v3336_v10, %v195_v59  ;;  %v247_v63 = vadd.f32 %v3338_v11, %v196_v60 }
0x1f6a   :  { %v428_v0 = vcombine.low %v246_v62, %v247_v63 }
0x1f6c   :  { %2808 = vst.sshfl [vmem:[#allocation2 + $0x44] sm:$0x33 pattern:$0x76325410] %v428_v0 }
0x1fd8   :  { %v2341_v3 = vpop.permute.xlu1 %2340 }
0x1fd9   :  { %v2343_v5 = vmul.f32 %v2341_v3, %v2337_v2 }
0x1fdb   :  { %2827 = vmatmul.mubr.msk.f32.vlgmr.msra.gmra.mrb[16].mxu0 %vm569_vm1, %v2343_v5 }
0x1fdc   :  { %3122 = vmatpush1.bf16.msra.mxu0 %v3361_v45  ;;  %2635 = vmatprep.mubr.f32.mxu0 %v3296_v1  ;;  %v2345_v45 = vld [vmem:[#allocation2 + $0x44] sm:$0xf] }
0x1fdd   :  { %3124 = vmatprep.subr.bf16.mxu0 %v3363_v46 }
0x1fe0   :  { %3126 = vmatpush1.bf16.msra.mxu0 %v3368_v51 }
0x1fe1   :  { %3128 = vmatprep.subr.bf16.mxu0 %v3372_v52 }
0x1fe4   :  { %3130 = vmatpush1.bf16.msra.mxu0 %v3376_v57  ;;  %v48_v57 = vld [vmem:[%s3825_s0 + $0x24] sm:$0x3] }
0x1fe5   :  { %3132 = vmatprep.subr.bf16.mxu0 %v3380_v58 }
0x1fe8   :  { %3134 = vmatpush1.bf16.msra.mxu0 %v3384_v61 }
0x20ae   :  { %v2415_v6 = vpop.f32.mrb[16].mxu0 }
0x20af   :  { %v2417_v7 = vpop.f32.mrb[17].mxu0 }
0x20b0   :  { %v2422_v12 = vcombine.low %v2415_v6, %v2417_v7 }
0x20b2   :  { %v2429_v13 = vrot.slane %v2422_v12, %v3344_v28 }
0x20b4   :  { %v2431_v14 = vadd.f32 %v2429_v13, %v2345_v45  ;;  %v2678_v13 = vld [vmem:[#allocation3 + $0x88] sm:$0xff]  ;;  %v2680_v45 = vld [vmem:[#allocation3 + $0x98] sm:$0xff] }
0x20b6   :  { %3229 = vtanh.f32 %v2431_v14  ;;  %v2677_v14 = vld [vmem:[#allocation3 + $0x80] sm:$0xff] }
0x20c0   :  { %v3230_v15 = vpop.eup %3229 }
0x20c1   :  { %v2433_v46 = vmul.f32 %v3230_v15, %v3347_v30  ;;  %v3135_v15 = vpack.c.bf16 %v2680_v45, %v2678_v13 }
0x20c3   :  { %v2434_v51 = vadd.f32 %v2433_v46, %v3350_v31  ;;  %v2679_v46 = vld [vmem:[#allocation3 + $0x90] sm:$0xff]  ;;  %3136 = vmatprep.subr.bf16.mxu1 %v3135_v15 }
0x20c5   :  { %2446 = vrot.lane.b32.xlu0 %v2434_v51, %s3295_s1  ;;  %v2437_v52 = vrot.slane %v2434_v51, 2  ;;  %v2435_v61 = vmul.f32 %v2434_v51, %v2333_v53 }
0x20c7   :  { %v2439_v58 = vmul.f32 %v2437_v52, %v2434_v51  ;;  %v2684_v51 = vld [vmem:[#allocation3 + $0xb8] sm:$0xff]  ;;  %v3137_v52 = vpack.c.bf16 %v2679_v46, %v2677_v14 }
0x20c9   :  { %142 = vperm.xlu0 %3160, %v48_v57   ;;  %2441 = vrot.lane.b32.xlu1 %v2439_v58, %s3295_s1  ;;  %v2681_v58 = vld [vmem:[#allocation3 + $0xa0] sm:$0xff] }
0x2137   :  { %v2447_v17 = vpop.permute.xlu0 %2446 }
0x2138   :  { %v2448_v25 = vrot.slane %v2447_v17, 2  ;;  %v2685_v17 = vld [vmem:[#allocation3 + $0xc0] sm:$0xff] }
0x213b   :  { %v2442_v41 = vpop.permute.xlu1 %2441 }
0x213c   :  { %v2444_v16 = vadd.f32 %v2442_v41, %v2435_v61  ;;  %v2683_v61 = vld [vmem:[#allocation3 + $0xb0] sm:$0xff] }
0x213d   :  { %v3141_v41 = vpack.c.bf16 %v2683_v61, %v2681_v58 }
0x213e   :  { %3231 = vtanh.f32 %v2444_v16 }
0x2148   :  { %v3232_v18 = vpop.eup %3231  ;;  %v143_v19 = vpop.permute.xlu0 %142 }
0x2149   :  { %v197_v20 = vmul.f32 %v3331_v8, %v143_v19  ;;  %v198_v21 = vmul.f32 %v3333_v9, %v143_v19  ;;  %2451 = vrot.lane.b32.xlu1 %v3232_v18, %s3295_s1  ;;  %v2687_v18 = vld [vmem:[#allocation3 + $0xd0] sm:$0xff]  ;;  %v2690_v19 = vld [vmem:[#allocation3 + $0xe8] sm:$0xff] }
0x214b   :  { %v248_v22 = vadd.f32 %v3336_v10, %v197_v20  ;;  %v249_v23 = vadd.f32 %v3338_v11, %v198_v21  ;;  %v2692_v20 = vld [vmem:[#allocation3 + $0xf8] sm:$0xff]  ;;  %v3145_v21 = vpack.c.bf16 %v2687_v18, %v2685_v17 }
0x214d   :  { %v436_v24 = vcombine.low %v248_v22, %v249_v23  ;;  %v3147_v22 = vpack.c.bf16 %v2692_v20, %v2690_v19  ;;  %v2689_v23 = vld [vmem:[#allocation3 + $0xe0] sm:$0xff] }
0x214f   :  { %2809 = vst.sshfl [vmem:[#allocation2 + $0x48] sm:$0x33 pattern:$0x76325410] %v436_v24  ;;  %v2691_v24 = vld [vmem:[#allocation3 + $0xf0] sm:$0xff] }
0x2156   :  { %v2456_v35 = vld [vmem:[#allocation2 + $0x48] sm:$0xf] }
0x21bb   :  { %v2452_v26 = vpop.permute.xlu1 %2451 }
0x21bc   :  { %v2454_v27 = vmul.f32 %v2452_v26, %v2448_v25  ;;  %v3149_v25 = vpack.c.bf16 %v2691_v24, %v2689_v23 }
0x21be   :  { %2828 = vmatmul.mubr.msk.f32.vlgmr.msra.gmra.mrb[16].mxu1 %vm569_vm1, %v2454_v27 }
0x21bf   :  { %2768 = vmatprep.mubr.f32.mxu1 %v3296_v1  ;;  %v49_v1 = vld [vmem:[%s3825_s0 + $0x26] sm:$0x3]  ;;  %3138 = vmatpush1.bf16.msra.mxu1 %v3137_v52  ;;  %s3297_s0 = smov [#allocation6]  }
0x21c0   :  { %s2782_s7 = sshll.u32 %s3297_s0, 4  ;;  %s2783_s7 = int_to_ptr.vmem [resolvable:$true] %s2782_s7 }
0x21c1   :  { %s3263_s8 = scalar_lea.vmem %s2783_s7, 32  ;;  %p3268_p9 = scmp.lt.s32.totalorder %s2783_s7, %s2783_s7 }
0x21c2   :  { %p3264_p8 = scmp.ne.s32.totalorder %s2783_s7, %s3263_s8  ;;  %p3269_p10 = scmp.lt.s32.totalorder %s3263_s8, %s3263_s8 }
0x21c4   :  { %p3270_p11 = por %p3269_p10, %p3268_p9 }
0x21c6   :  { %p3271_p12 = pnand %p3270_p11, %p3264_p8 }
0x2291   :  { %v2526_v29 = vpop.f32.mrb[16].mxu1 }
0x2292   :  { %v2528_v32 = vpop.f32.mrb[17].mxu1 }
0x2293   :  { %v2533_v33 = vcombine.low %v2526_v29, %v2528_v32 }
0x2295   :  { %v2540_v34 = vrot.slane %v2533_v33, %v3344_v28 }
0x2297   :  { %v2542_v36 = vadd.f32 %v2540_v34, %v2456_v35 }
0x2299   :  { %3233 = vtanh.f32 %v2542_v36 }
0x22a3   :  { %v3234_v37 = vpop.eup %3233 }
0x22a4   :  { %v2544_v38 = vmul.f32 %v3234_v37, %v3347_v30  ;;  %v2694_v37 = vld [vmem:[#allocation3 + $0x102] ss:$8 sm:$0x3] }
0x22a6   :  { %v2545_v39 = vadd.f32 %v2544_v38, %v3350_v31  ;;  %v2699_v38 = vrot.slane %v2694_v37, %v3328_v4 }
0x22a8   :  { %2557 = vrot.lane.b32.xlu0 %v2545_v39, %s3295_s1  ;;  %v2548_v40 = vrot.slane %v2545_v39, 2  ;;  %v2546_v43 = vmul.f32 %v2545_v39, %v2444_v16 }
0x22aa   :  { %v2550_v42 = vmul.f32 %v2548_v40, %v2545_v39 }
0x22ac   :  { %147 = vperm.xlu0 %3160, %v49_v1   ;;  %2552 = vrot.lane.b32.xlu1 %v2550_v42, %s3295_s1 }
0x231a   :  { %v2558_v48 = vpop.permute.xlu0 %2557 }
0x231b   :  { %v2559_v60 = vrot.slane %v2558_v48, 2 }
0x231e   :  { %v2553_v44 = vpop.permute.xlu1 %2552 }
0x231f   :  { %v2555_v47 = vadd.f32 %v2553_v44, %v2546_v43 }
0x2321   :  { %3235 = vtanh.f32 %v2555_v47 }
0x232b   :  { %v3236_v49 = vpop.eup %3235  ;;  %v148_v50 = vpop.permute.xlu0 %147 }
0x232c   :  { %v199_v53 = vmul.f32 %v3331_v8, %v148_v50  ;;  %v200_v54 = vmul.f32 %v3333_v9, %v148_v50  ;;  %2562 = vrot.lane.b32.xlu1 %v3236_v49, %s3295_s1 }
0x232e   :  { %v250_v55 = vadd.f32 %v3336_v10, %v199_v53  ;;  %v251_v56 = vadd.f32 %v3338_v11, %v200_v54 }
0x2330   :  { %v444_v59 = vcombine.low %v250_v55, %v251_v56 }
0x2332   :  { %2810 = vst.sshfl [vmem:[#allocation2 + $0x4c] sm:$0x33 pattern:$0x76325410] %v444_v59 }
0x2339   :  { %v2567_v5 = vld [vmem:[#allocation2 + $0x4c] sm:$0xf] }
0x239e   :  { %v2563_v62 = vpop.permute.xlu1 %2562 }
0x239f   :  { %v2565_v63 = vmul.f32 %v2563_v62, %v2559_v60 }
0x23a1   :  { %2829 = vmatmul.mubr.msk.f32.vlgmr.msra.gmra.mrb[18].mxu0 %vm569_vm1, %v2565_v63 }
0x2474   :  { %v2637_v0 = vpop.f32.mrb[18].mxu0 }
0x2475   :  { %v2639_v2 = vpop.f32.mrb[19].mxu0 }
0x2476   :  { %v2644_v3 = vcombine.low %v2637_v0, %v2639_v2 }
0x2478   :  { %v2651_v8 = vrot.slane %v2644_v3, %v3344_v28  ;;  %v2682_v28 = vld [vmem:[#allocation3 + $0xa8] sm:$0xff] }
0x2479   :  { %v3139_v57 = vpack.c.bf16 %v2684_v51, %v2682_v28 }
0x247a   :  { %v2653_v9 = vadd.f32 %v2651_v8, %v2567_v5 }
0x247b   :  { %3140 = vmatprep.subr.bf16.mxu1 %v3139_v57 }
0x247c   :  { %3237 = vtanh.f32 %v2653_v9  ;;  %3142 = vmatpush1.bf16.msra.mxu1 %v3141_v41 }
0x2486   :  { %v3238_v6 = vpop.eup %3237 }
0x2487   :  { %v2655_v10 = vmul.f32 %v3238_v6, %v3347_v30  ;;  %v2686_v30 = vld [vmem:[#allocation3 + $0xc8] sm:$0xff] }
0x2489   :  { %v2656_v11 = vadd.f32 %v2655_v10, %v3350_v31  ;;  %v2688_v31 = vld [vmem:[#allocation3 + $0xd8] sm:$0xff] }
0x248a   :  { %v3143_v16 = vpack.c.bf16 %v2688_v31, %v2686_v30 }
0x248b   :  { %2668 = vrot.lane.b32.xlu0 %v2656_v11, %s3295_s1  ;;  %v2659_v7 = vrot.slane %v2656_v11, 2  ;;  %v2657_v26 = vmul.f32 %v2656_v11, %v2555_v47 }
0x248c   :  { %3144 = vmatprep.subr.bf16.mxu1 %v3143_v16 }
0x248d   :  { %v2661_v12 = vmul.f32 %v2659_v7, %v2656_v11  ;;  %3146 = vmatpush1.bf16.msra.mxu1 %v3145_v21 }
0x248e   :  { %3148 = vmatprep.subr.bf16.mxu1 %v3147_v22 }
0x248f   :  { %2663 = vrot.lane.b32.xlu1 %v2661_v12, %s3295_s1 }
0x2491   :  { %3150 = vmatpush1.bf16.msra.mxu1 %v3149_v25 }
0x24fd   :  { %v2669_v33 = vpop.permute.xlu0 %2668 }
0x24fe   :  { %v2670_v34 = vrot.slane %v2669_v33, 2 }
0x2501   :  { %v2664_v27 = vpop.permute.xlu1 %2663 }
0x2502   :  { %v2666_v29 = vadd.f32 %v2664_v27, %v2657_v26 }
0x2504   :  { %3239 = vtanh.f32 %v2666_v29 }
0x250e   :  { %v3240_v32 = vpop.eup %3239 }
0x250f   :  { %2673 = vrot.lane.b32.xlu1 %v3240_v32, %s3295_s1 }
0x2581   :  { %v2674_v35 = vpop.permute.xlu1 %2673 }
0x2582   :  { %v2676_v36 = vmul.f32 %v2674_v35, %v2670_v34 }
0x2584   :  { %2830 = vmatmul.mubr.msk.f32.vlgmr.msra.gmra.mrb[18].mxu1 %vm569_vm1, %v2676_v36 }
0x2657   :  { %v2770_v39 = vpop.f32.mrb[18].mxu1 }
0x2658   :  { %v2771_v40 = vadd.f32 %v2770_v39, %v2699_v38  ;;  %v2772_v1 = vpop.f32.mrb[19].mxu1 }
0x265a   :  { %2775 = vst.msk [vmem:[#allocation6] sm:$0x3] %vm2774_vm2, %v2771_v40 }
0x265b   :  { %3274 = shalt.err (!%p3271_p12)
}
0x265c   :  { %s3275_s10 = scalar_lea.hbm %s3827_s2, 32 }
0x265d   :  { %p3276_p13 = scmp.ne.s32.totalorder %s3827_s2, %s3275_s10  ;;  %p3279_p0 = scmp.lt.u32.totalorder %s3275_s10, %s3827_s2 }
0x265f   :  { %p3281_p1 = pnand %p3279_p0, %p3276_p13 }
0x2661   :  { %3284 = shalt.err (!%p3281_p1)
}
0x2662   :  { %2785 = dma.vmem_to_hbm [thread:$0]  %s2783_s7, 32, %s3827_s2, [#allocation5]  }
0x2663   :  { %3287 = dma.done.wait [#allocation5], 32  }
0x2664   :  { %3288 = vsyncadd [#allocation5], 4294967264 }
0x2665   :  { %2789 = vsyncpa [#allocation4], 1 }
0x2666   :  { %2790 = vsyncpa [#allocation5], 1 }

</bundles_post_ra>
